<compile_context>
chip_gen: v6e
topology: v6e:2x2x1
jax: 0.10.0
libtpu: 0.0.40
codegen_flags: <defaults>
</compile_context>

<pallas_src>
import functools

import numpy as np
import jax
import jax.numpy as jnp
from jax import lax
from jax.experimental import pallas as pl
from jax.experimental.pallas import tpu as pltpu


def _round_up(x: int, m: int) -> int:
    return (x + m - 1) // m * m


# ----------------------------------------------------------------------------
# Bilinear (align_corners=True) interpolation matrix, built at trace time.
# ----------------------------------------------------------------------------
def bilinear_matrix(n_in: int, n_out: int) -> np.ndarray:
    """(n_out, n_in) matrix M s.t. y = M @ x is align_corners=True upsampling."""
    if n_out == 1:
        src = np.zeros((1,), dtype=np.float64)
    else:
        src = np.arange(n_out, dtype=np.float64) * (n_in - 1) / (n_out - 1)
    lo = np.clip(np.floor(src).astype(np.int64), 0, n_in - 1)
    hi = np.minimum(lo + 1, n_in - 1)
    frac = (src - lo).astype(np.float32)
    m = np.zeros((n_out, n_in), dtype=np.float32)
    m[np.arange(n_out), lo] += 1.0 - frac
    m[np.arange(n_out), hi] += frac
    return m


# ----------------------------------------------------------------------------
# Fused kernel: conv1 -> BN -> LeakyReLU -> conv2 -> BN -> LeakyReLU
# (input already in the zero-padded, lane-dense "ext" layout, bf16)
# ----------------------------------------------------------------------------
def _dconv_kernel(x_ref, w1_ref, w2_ref, mask_ref, g1_ref, b1_ref, g2_ref,
                  b2_ref, o_ref, aext_ref, *,
                  Cin_p, Cmid_p, Cout_p, WP, R0, RL, NLE, count, eps, slope):
    mask = mask_ref[...]                 # (1, RL) f32, 1 at real image pixels
    inv_cnt = 1.0 / count

    def conv_bn_lrelu(src_ref, nch, w, cl, g, b):
        # 3x3 "SAME" conv = 9 accumulating matmuls on lane-shifted views.
        y = jnp.zeros((cl, RL), jnp.float32)
        for dy in range(3):
            for dx in range(3):
                t = dy * 3 + dx
                s = R0 + (dy - 1) * WP + (dx - 1)            # static, in-bounds
                y = y + jnp.dot(w[:, t * nch:(t + 1) * nch],
                                src_ref[:, s:s + RL],
                                preferred_element_type=jnp.float32)
        # training-mode BatchNorm over the N*H*W real pixels (two-pass var)
        mean = jnp.sum(y * mask, axis=1, keepdims=True) * inv_cnt
        cen = (y - mean) * mask
        var = jnp.sum(cen * cen, axis=1, keepdims=True) * inv_cnt
        scale = g * lax.rsqrt(var + eps)
        shift = b - mean * scale
        a = y * scale + shift
        a = jnp.where(a > 0, a, slope * a)                   # LeakyReLU(0.01)
        return a * mask                                      # re-zero pad lanes

    # conv1 -> BN -> LeakyReLU, reading the wrapper-built ext input directly
    a1 = conv_bn_lrelu(x_ref, Cin_p, w1_ref[...], Cmid_p,
                       g1_ref[...], b1_ref[...])

    # Re-pad for conv2: only the margins outside the computed region need
    # explicit zeros (a1 is already masked to zero inside it).
    aext_ref[:, 0:R0] = jnp.zeros((Cmid_p, R0), jnp.bfloat16)
    aext_ref[:, R0 + RL:NLE] = jnp.zeros((Cmid_p, NLE - R0 - RL), jnp.bfloat16)
    aext_ref[:, R0:R0 + RL] = a1.astype(jnp.bfloat16)        # lane-aligned, dense

    # conv2 -> BN -> LeakyReLU; dense (Cout_p, RL) output store at origin 0
    o_ref[...] = conv_bn_lrelu(aext_ref, Cmid_p, w2_ref[...], Cout_p,
                               g2_ref[...], b2_ref[...])


# ----------------------------------------------------------------------------
# Wrapper: layout plumbing (upsample / pad / concat / ext flattening) + call
# ----------------------------------------------------------------------------
def up_forward(x1, x2, params, eps=1e-5, slope=0.01):
    """Up.forward(x1, x2).  Inputs/outputs NCHW (PyTorch layout)."""
    N, C1, H1, W1 = x1.shape
    N2, C2, H, W = x2.shape
    assert N == N2
    Cin = C1 + C2
    Cmid = params["w1"].shape[-1]
    Cout = params["w2"].shape[-1]
    assert params["w1"].shape[2] == Cin and params["w2"].shape[2] == Cmid

    # ---- layout constants (lane-dense, vreg-aligned) ----
    WP = W + 2                          # conv-padded plane width
    HPE = H + 4                         # 2 pad/margin rows above and below
    LE = HPE * WP                       # lanes per (batch, channel) plane
    R0 = _round_up(2 * WP, 128)         # computed region starts on lane bdry
    head = R0 - 2 * WP                  # extra zero lanes before plane 0
    RL = _round_up(N * LE - 4 * WP, 128)          # computed region (mult of 128)
    NLE = _round_up(R0 + RL + 2 * WP, 128)        # total ext buffer lanes
    Cin_p = _round_up(Cin, 8)
    Cmid_p = _round_up(Cmid, 8)
    Cout_p = _round_up(Cout, 8)

    # ---- upsample(x1, bilinear, align_corners=True) applied separably,
    #      then F.pad + concat([x2, x1]) -- ~10 KB of wrapper-side plumbing ----
    wh = jnp.asarray(bilinear_matrix(H1, 2 * H1))
    ww = jnp.asarray(bilinear_matrix(W1, 2 * W1))
    x1u = jnp.einsum("nchw,Hh,Ww->ncHW", x1, wh, ww)
    dY, dX = H - 2 * H1, W - 2 * W1
    assert dY >= 0 and dX >= 0
    x1u = jnp.pad(x1u, ((0, 0), (0, 0), (dY // 2, dY - dY // 2),
                        (dX // 2, dX - dX // 2)))
    xcat = jnp.concatenate([x2, x1u], axis=1)                 # (N, Cin, H, W)

    # zero-padded ext layout: (Cin_p sublanes, NLE lanes), bf16 for the MXU
    xe = jnp.transpose(xcat, (1, 0, 2, 3))
    xe = jnp.pad(xe, ((0, Cin_p - Cin), (0, 0), (2, 2), (1, 1)))
    xe = xe.reshape(Cin_p, N * LE)
    xe = jnp.pad(xe, ((0, 0), (head, NLE - head - N * LE)))
    xext = xe.astype(jnp.bfloat16)

    # ---- per-tap conv weight matrices (bf16), channel-padded ----
    def pack_taps(w_hwio, ci, co, ci_p, co_p):
        w = jnp.transpose(w_hwio, (0, 1, 3, 2))               # (3,3,co,ci)
        w = jnp.pad(w, ((0, 0), (0, 0), (0, co_p - co), (0, ci_p - ci)))
        w = jnp.transpose(w.reshape(9, co_p, ci_p), (1, 0, 2))
        return w.reshape(co_p, 9 * ci_p).astype(jnp.bfloat16)

    w1m = pack_taps(params["w1"], Cin, Cmid, Cin_p, Cmid_p)
    w2m = pack_taps(params["w2"], Cmid, Cout, Cmid_p, Cout_p)

    def pad_cp(v, cp):
        return jnp.pad(v.reshape(-1, 1), ((0, cp - v.shape[0]), (0, 0)))

    g1 = pad_cp(params["g1"], Cmid_p)
    b1 = pad_cp(params["b1"], Cmid_p)
    g2 = pad_cp(params["g2"], Cout_p)
    b2 = pad_cp(params["b2"], Cout_p)

    # mask of real image pixels within the computed region (trace-time const)
    m = np.zeros((NLE,), np.float32)
    mm = np.zeros((N, HPE, WP), np.float32)
    mm[:, 2:2 + H, 1:1 + W] = 1.0
    m[head:head + N * LE] = mm.reshape(-1)
    mask = jnp.asarray(m[R0:R0 + RL].reshape(1, RL))

    kernel = functools.partial(
        _dconv_kernel, Cin_p=Cin_p, Cmid_p=Cmid_p, Cout_p=Cout_p, WP=WP,
        R0=R0, RL=RL, NLE=NLE, count=float(N * H * W), eps=eps, slope=slope)

    def fs(shape):
        return pl.BlockSpec(shape, lambda i: (0, 0))

    inputs = (xext, w1m, w2m, mask, g1, b1, g2, b2)
    out_ext = pl.pallas_call(
        kernel,
        out_shape=jax.ShapeDtypeStruct((Cout_p, RL), jnp.float32),
        grid=(1,),
        in_specs=[fs(v.shape) for v in inputs],
        out_specs=fs((Cout_p, RL)),
        scratch_shapes=[pltpu.VMEM((Cmid_p, NLE), jnp.bfloat16)],
        compiler_params=pltpu.CompilerParams(
            dimension_semantics=("arbitrary",)),
    )(*inputs)

    # tiny layout plumbing back to NCHW (slice + transpose)
    tot = N * LE
    if RL >= tot:
        o = out_ext[:, :tot]
    else:
        o = jnp.pad(out_ext, ((0, 0), (0, tot - RL)))
    o = o.reshape(Cout_p, N, HPE, WP)[:Cout, :, 0:H, 1:1 + W]
    return jnp.transpose(o, (1, 0, 2, 3))


# ----------------------------------------------------------------------------
# Pure-JAX reference (sanity check, f32 everywhere)
# ----------------------------------------------------------------------------
def ref_forward(x1, x2, params, eps=1e-5, slope=0.01):
    N, C1, H1, W1 = x1.shape
    H, W = x2.shape[2], x2.shape[3]
    wh = jnp.asarray(bilinear_matrix(H1, 2 * H1))
    ww = jnp.asarray(bilinear_matrix(W1, 2 * W1))
    x1u = jnp.einsum("nchw,Hh,Ww->ncHW", x1, wh, ww)
    dY, dX = H - x1u.shape[2], W - x1u.shape[3]
    x1u = jnp.pad(x1u, ((0, 0), (0, 0), (dY // 2, dY - dY // 2),
                        (dX // 2, dX - dX // 2)))
    x = jnp.concatenate([x2, x1u], axis=1)
    x = jnp.transpose(x, (0, 2, 3, 1))

    def block(x, w, g, b):
        y = lax.conv_general_dilated(
            x, w, (1, 1), "SAME", dimension_numbers=("NHWC", "HWIO", "NHWC"))
        mean = y.mean(axis=(0, 1, 2))
        var = y.var(axis=(0, 1, 2))
        yn = (y - mean) / jnp.sqrt(var + eps) * g + b
        return jnp.where(yn > 0, yn, slope * yn)

    x = block(x, params["w1"], params["g1"], params["b1"])
    x = block(x, params["w2"], params["g2"], params["b2"])
    return jnp.transpose(x, (0, 3, 1, 2))


# ----------------------------------------------------------------------------
if __name__ == "__main__":
    # Up(in_channels=8, out_channels=4): x1 has 4 channels at 8x8,
    # x2 (skip connection) has 4 channels at 16x16.
    N, IN_CH, OUT_CH = 2, 8, 4
    C1 = C2 = IN_CH // 2
    H1, W1 = 8, 8
    H2, W2 = 16, 16

    key = jax.random.PRNGKey(0)
    k1, k2, kw1, kw2, kg1, kb1, kg2, kb2 = jax.random.split(key, 8)

    x1 = jax.random.normal(k1, (N, C1, H1, W1), jnp.float32)
    x2 = jax.random.normal(k2, (N, C2, H2, W2), jnp.float32)

    # Conv weights in PyTorch OIHW, converted to HWIO.
    w1_oihw = 0.1 * jax.random.normal(kw1, (OUT_CH, IN_CH, 3, 3), jnp.float32)
    w2_oihw = 0.1 * jax.random.normal(kw2, (OUT_CH, OUT_CH, 3, 3), jnp.float32)
    params = {
        "w1": jnp.transpose(w1_oihw, (2, 3, 1, 0)),
        "w2": jnp.transpose(w2_oihw, (2, 3, 1, 0)),
        "g1": 1.0 + 0.1 * jax.random.normal(kg1, (OUT_CH,), jnp.float32),
        "b1": 0.1 * jax.random.normal(kb1, (OUT_CH,), jnp.float32),
        "g2": 1.0 + 0.1 * jax.random.normal(kg2, (OUT_CH,), jnp.float32),
        "b2": 0.1 * jax.random.normal(kb2, (OUT_CH,), jnp.float32),
    }

    up_jit = jax.jit(up_forward)
    out = jax.block_until_ready(up_jit(x1, x2, params))
    ref = jax.block_until_ready(ref_forward(x1, x2, params))

    assert out.shape == (N, OUT_CH, H2, W2), out.shape
    assert np.all(np.isfinite(np.asarray(out)))
    # bf16 MXU operands (per perf review) -> slightly looser tolerance than f32
    np.testing.assert_allclose(np.asarray(out), np.asarray(ref),
                               rtol=2e-2, atol=2e-2)

    print("KERNEL_OK")
</pallas_src>

<mosaic_0001>
module attributes {stable_mosaic.version = 11 : i64} {
  func.func @_dconv_kernel(%arg0: i32, %arg1: memref<8x1024xbf16, #tpu.memory_space<vmem>>, %arg2: memref<8x72xbf16, #tpu.memory_space<vmem>>, %arg3: memref<8x72xbf16, #tpu.memory_space<vmem>>, %arg4: memref<1x768xf32, #tpu.memory_space<vmem>>, %arg5: memref<8x1xf32, #tpu.memory_space<vmem>>, %arg6: memref<8x1xf32, #tpu.memory_space<vmem>>, %arg7: memref<8x1xf32, #tpu.memory_space<vmem>>, %arg8: memref<8x1xf32, #tpu.memory_space<vmem>>, %arg9: memref<8x768xf32, #tpu.memory_space<vmem>>, %arg10: memref<8x1024xbf16, #tpu.memory_space<vmem>>) attributes {dimension_semantics = [#tpu.dimension_semantics<arbitrary>], iteration_bounds = array<i64: 1>, scalar_prefetch = 0 : i64, scratch_operands = 1 : i64, tpu.core_type = #tpu.core_type<tc>, window_params = [{pipeline_mode = #tpu.pipeline_mode<synchronous>, transform_indices = @transform_0, window_bounds = array<i64: 8, 1024>}, {pipeline_mode = #tpu.pipeline_mode<synchronous>, transform_indices = @transform_1, window_bounds = array<i64: 8, 72>}, {pipeline_mode = #tpu.pipeline_mode<synchronous>, transform_indices = @transform_2, window_bounds = array<i64: 8, 72>}, {pipeline_mode = #tpu.pipeline_mode<synchronous>, transform_indices = @transform_3, window_bounds = array<i64: 1, 768>}, {pipeline_mode = #tpu.pipeline_mode<synchronous>, transform_indices = @transform_4, window_bounds = array<i64: 8, 1>}, {pipeline_mode = #tpu.pipeline_mode<synchronous>, transform_indices = @transform_5, window_bounds = array<i64: 8, 1>}, {pipeline_mode = #tpu.pipeline_mode<synchronous>, transform_indices = @transform_6, window_bounds = array<i64: 8, 1>}, {pipeline_mode = #tpu.pipeline_mode<synchronous>, transform_indices = @transform_7, window_bounds = array<i64: 8, 1>}, {pipeline_mode = #tpu.pipeline_mode<synchronous>, transform_indices = @transform_8, window_bounds = array<i64: 8, 768>}]} {
    %c0 = arith.constant 0 : index
    %c0_0 = arith.constant 0 : index
    %0 = vector.load %arg4[%c0, %c0_0] : memref<1x768xf32, #tpu.memory_space<vmem>>, vector<1x768xf32>
    %c0_1 = arith.constant 0 : index
    %c0_2 = arith.constant 0 : index
    %1 = vector.load %arg2[%c0_1, %c0_2] : memref<8x72xbf16, #tpu.memory_space<vmem>>, vector<8x72xbf16>
    %c0_3 = arith.constant 0 : index
    %c0_4 = arith.constant 0 : index
    %2 = vector.load %arg5[%c0_3, %c0_4] : memref<8x1xf32, #tpu.memory_space<vmem>>, vector<8x1xf32>
    %c0_5 = arith.constant 0 : index
    %c0_6 = arith.constant 0 : index
    %3 = vector.load %arg6[%c0_5, %c0_6] : memref<8x1xf32, #tpu.memory_space<vmem>>, vector<8x1xf32>
    %cst = arith.constant 0.000000e+00 : f32
    %4 = vector.broadcast %cst : f32 to vector<8x768xf32>
    %5 = vector.extract_strided_slice %1 {offsets = [0, 0], sizes = [8, 8], strides = [1, 1]} : vector<8x72xbf16> to vector<8x8xbf16>
    %c0_7 = arith.constant 0 : index
    %c109 = arith.constant 109 : index
    %6 = vector.load %arg1[%c0_7, %c109] : memref<8x1024xbf16, #tpu.memory_space<vmem>>, vector<8x768xbf16>
    %cst_8 = arith.constant dense<0.000000e+00> : vector<8x768xf32>
    %7 = tpu.matmul %5, %6, %cst_8 {dimension_numbers = #tpu.dot_dimension_numbers<[1], [0], [0], [1], [0, 0, 1, 1], [], []>} : vector<8x8xbf16>, vector<8x768xbf16>, vector<8x768xf32> -> vector<8x768xf32>
    %8 = arith.addf %4, %7 : vector<8x768xf32>
    %9 = vector.extract_strided_slice %1 {offsets = [0, 8], sizes = [8, 8], strides = [1, 1]} : vector<8x72xbf16> to vector<8x8xbf16>
    %c0_9 = arith.constant 0 : index
    %c110 = arith.constant 110 : index
    %10 = vector.load %arg1[%c0_9, %c110] : memref<8x1024xbf16, #tpu.memory_space<vmem>>, vector<8x768xbf16>
    %cst_10 = arith.constant dense<0.000000e+00> : vector<8x768xf32>
    %11 = tpu.matmul %9, %10, %cst_10 {dimension_numbers = #tpu.dot_dimension_numbers<[1], [0], [0], [1], [0, 0, 1, 1], [], []>} : vector<8x8xbf16>, vector<8x768xbf16>, vector<8x768xf32> -> vector<8x768xf32>
    %12 = arith.addf %8, %11 : vector<8x768xf32>
    %13 = vector.extract_strided_slice %1 {offsets = [0, 16], sizes = [8, 8], strides = [1, 1]} : vector<8x72xbf16> to vector<8x8xbf16>
    %c0_11 = arith.constant 0 : index
    %c111 = arith.constant 111 : index
    %14 = vector.load %arg1[%c0_11, %c111] : memref<8x1024xbf16, #tpu.memory_space<vmem>>, vector<8x768xbf16>
    %cst_12 = arith.constant dense<0.000000e+00> : vector<8x768xf32>
    %15 = tpu.matmul %13, %14, %cst_12 {dimension_numbers = #tpu.dot_dimension_numbers<[1], [0], [0], [1], [0, 0, 1, 1], [], []>} : vector<8x8xbf16>, vector<8x768xbf16>, vector<8x768xf32> -> vector<8x768xf32>
    %16 = arith.addf %12, %15 : vector<8x768xf32>
    %17 = vector.extract_strided_slice %1 {offsets = [0, 24], sizes = [8, 8], strides = [1, 1]} : vector<8x72xbf16> to vector<8x8xbf16>
    %c0_13 = arith.constant 0 : index
    %c127 = arith.constant 127 : index
    %18 = vector.load %arg1[%c0_13, %c127] : memref<8x1024xbf16, #tpu.memory_space<vmem>>, vector<8x768xbf16>
    %cst_14 = arith.constant dense<0.000000e+00> : vector<8x768xf32>
    %19 = tpu.matmul %17, %18, %cst_14 {dimension_numbers = #tpu.dot_dimension_numbers<[1], [0], [0], [1], [0, 0, 1, 1], [], []>} : vector<8x8xbf16>, vector<8x768xbf16>, vector<8x768xf32> -> vector<8x768xf32>
    %20 = arith.addf %16, %19 : vector<8x768xf32>
    %21 = vector.extract_strided_slice %1 {offsets = [0, 32], sizes = [8, 8], strides = [1, 1]} : vector<8x72xbf16> to vector<8x8xbf16>
    %c0_15 = arith.constant 0 : index
    %c128 = arith.constant 128 : index
    %22 = vector.load %arg1[%c0_15, %c128] : memref<8x1024xbf16, #tpu.memory_space<vmem>>, vector<8x768xbf16>
    %cst_16 = arith.constant dense<0.000000e+00> : vector<8x768xf32>
    %23 = tpu.matmul %21, %22, %cst_16 {dimension_numbers = #tpu.dot_dimension_numbers<[1], [0], [0], [1], [0, 0, 1, 1], [], []>} : vector<8x8xbf16>, vector<8x768xbf16>, vector<8x768xf32> -> vector<8x768xf32>
    %24 = arith.addf %20, %23 : vector<8x768xf32>
    %25 = vector.extract_strided_slice %1 {offsets = [0, 40], sizes = [8, 8], strides = [1, 1]} : vector<8x72xbf16> to vector<8x8xbf16>
    %c0_17 = arith.constant 0 : index
    %c129 = arith.constant 129 : index
    %26 = vector.load %arg1[%c0_17, %c129] : memref<8x1024xbf16, #tpu.memory_space<vmem>>, vector<8x768xbf16>
    %cst_18 = arith.constant dense<0.000000e+00> : vector<8x768xf32>
    %27 = tpu.matmul %25, %26, %cst_18 {dimension_numbers = #tpu.dot_dimension_numbers<[1], [0], [0], [1], [0, 0, 1, 1], [], []>} : vector<8x8xbf16>, vector<8x768xbf16>, vector<8x768xf32> -> vector<8x768xf32>
    %28 = arith.addf %24, %27 : vector<8x768xf32>
    %29 = vector.extract_strided_slice %1 {offsets = [0, 48], sizes = [8, 8], strides = [1, 1]} : vector<8x72xbf16> to vector<8x8xbf16>
    %c0_19 = arith.constant 0 : index
    %c145 = arith.constant 145 : index
    %30 = vector.load %arg1[%c0_19, %c145] : memref<8x1024xbf16, #tpu.memory_space<vmem>>, vector<8x768xbf16>
    %cst_20 = arith.constant dense<0.000000e+00> : vector<8x768xf32>
    %31 = tpu.matmul %29, %30, %cst_20 {dimension_numbers = #tpu.dot_dimension_numbers<[1], [0], [0], [1], [0, 0, 1, 1], [], []>} : vector<8x8xbf16>, vector<8x768xbf16>, vector<8x768xf32> -> vector<8x768xf32>
    %32 = arith.addf %28, %31 : vector<8x768xf32>
    %33 = vector.extract_strided_slice %1 {offsets = [0, 56], sizes = [8, 8], strides = [1, 1]} : vector<8x72xbf16> to vector<8x8xbf16>
    %c0_21 = arith.constant 0 : index
    %c146 = arith.constant 146 : index
    %34 = vector.load %arg1[%c0_21, %c146] : memref<8x1024xbf16, #tpu.memory_space<vmem>>, vector<8x768xbf16>
    %cst_22 = arith.constant dense<0.000000e+00> : vector<8x768xf32>
    %35 = tpu.matmul %33, %34, %cst_22 {dimension_numbers = #tpu.dot_dimension_numbers<[1], [0], [0], [1], [0, 0, 1, 1], [], []>} : vector<8x8xbf16>, vector<8x768xbf16>, vector<8x768xf32> -> vector<8x768xf32>
    %36 = arith.addf %32, %35 : vector<8x768xf32>
    %37 = vector.extract_strided_slice %1 {offsets = [0, 64], sizes = [8, 8], strides = [1, 1]} : vector<8x72xbf16> to vector<8x8xbf16>
    %c0_23 = arith.constant 0 : index
    %c147 = arith.constant 147 : index
    %38 = vector.load %arg1[%c0_23, %c147] : memref<8x1024xbf16, #tpu.memory_space<vmem>>, vector<8x768xbf16>
    %cst_24 = arith.constant dense<0.000000e+00> : vector<8x768xf32>
    %39 = tpu.matmul %37, %38, %cst_24 {dimension_numbers = #tpu.dot_dimension_numbers<[1], [0], [0], [1], [0, 0, 1, 1], [], []>} : vector<8x8xbf16>, vector<8x768xbf16>, vector<8x768xf32> -> vector<8x768xf32>
    %40 = arith.addf %36, %39 : vector<8x768xf32>
    %41 = vector.broadcast %0 : vector<1x768xf32> to vector<8x768xf32>
    %42 = arith.mulf %40, %41 : vector<8x768xf32>
    %cst_25 = arith.constant dense<0.000000e+00> : vector<8xf32>
    %43 = vector.multi_reduction <add>, %42, %cst_25 [1] : vector<8x768xf32> to vector<8xf32>
    %44 = vector.shape_cast %43 : vector<8xf32> to vector<8x1xf32>
    %cst_26 = arith.constant 0.001953125 : f32
    %45 = vector.broadcast %cst_26 : f32 to vector<8x1xf32>
    %46 = arith.mulf %44, %45 : vector<8x1xf32>
    %47 = vector.broadcast %46 : vector<8x1xf32> to vector<8x768xf32>
    %48 = arith.subf %40, %47 : vector<8x768xf32>
    %49 = vector.broadcast %0 : vector<1x768xf32> to vector<8x768xf32>
    %50 = arith.mulf %48, %49 : vector<8x768xf32>
    %51 = arith.mulf %50, %50 : vector<8x768xf32>
    %cst_27 = arith.constant dense<0.000000e+00> : vector<8xf32>
    %52 = vector.multi_reduction <add>, %51, %cst_27 [1] : vector<8x768xf32> to vector<8xf32>
    %53 = vector.shape_cast %52 : vector<8xf32> to vector<8x1xf32>
    %cst_28 = arith.constant 0.001953125 : f32
    %54 = vector.broadcast %cst_28 : f32 to vector<8x1xf32>
    %55 = arith.mulf %53, %54 : vector<8x1xf32>
    %cst_29 = arith.constant 9.99999974E-6 : f32
    %56 = vector.broadcast %cst_29 : f32 to vector<8x1xf32>
    %57 = arith.addf %55, %56 : vector<8x1xf32>
    %58 = math.rsqrt %57 : vector<8x1xf32>
    %59 = arith.mulf %2, %58 : vector<8x1xf32>
    %60 = arith.mulf %46, %59 : vector<8x1xf32>
    %61 = arith.subf %3, %60 : vector<8x1xf32>
    %62 = vector.broadcast %59 : vector<8x1xf32> to vector<8x768xf32>
    %63 = arith.mulf %40, %62 : vector<8x768xf32>
    %64 = vector.broadcast %61 : vector<8x1xf32> to vector<8x768xf32>
    %65 = arith.addf %63, %64 : vector<8x768xf32>
    %cst_30 = arith.constant 0.000000e+00 : f32
    %66 = vector.broadcast %cst_30 : f32 to vector<8x768xf32>
    %67 = arith.cmpf ogt, %65, %66 : vector<8x768xf32>
    %cst_31 = arith.constant 0.00999999977 : f32
    %68 = vector.broadcast %cst_31 : f32 to vector<8x768xf32>
    %69 = arith.mulf %68, %65 : vector<8x768xf32>
    %70 = arith.select %67, %65, %69 : vector<8x768xi1>, vector<8x768xf32>
    %71 = vector.broadcast %0 : vector<1x768xf32> to vector<8x768xf32>
    %72 = arith.mulf %70, %71 : vector<8x768xf32>
    %cst_32 = arith.constant 0.000000e+00 : bf16
    %73 = vector.broadcast %cst_32 : bf16 to vector<8x128xbf16>
    %c0_33 = arith.constant 0 : index
    %c0_34 = arith.constant 0 : index
    %74 = vector.load %arg10[%c0_33, %c0_34] : memref<8x1024xbf16, #tpu.memory_space<vmem>>, vector<8x128xbf16>
    tpu.vector_store %arg10[%c0_33, %c0_34], %73 {strides = array<i32>} : memref<8x1024xbf16, #tpu.memory_space<vmem>>, vector<8x128xbf16>,
    %cst_35 = arith.constant 0.000000e+00 : bf16
    %75 = vector.broadcast %cst_35 : bf16 to vector<8x128xbf16>
    %c0_36 = arith.constant 0 : index
    %c896 = arith.constant 896 : index
    %76 = vector.load %arg10[%c0_36, %c896] : memref<8x1024xbf16, #tpu.memory_space<vmem>>, vector<8x128xbf16>
    tpu.vector_store %arg10[%c0_36, %c896], %75 {strides = array<i32>} : memref<8x1024xbf16, #tpu.memory_space<vmem>>, vector<8x128xbf16>,
    %77 = arith.truncf %72 : vector<8x768xf32> to vector<8x768xbf16>
    %c0_37 = arith.constant 0 : index
    %c128_38 = arith.constant 128 : index
    %78 = vector.load %arg10[%c0_37, %c128_38] : memref<8x1024xbf16, #tpu.memory_space<vmem>>, vector<8x768xbf16>
    tpu.vector_store %arg10[%c0_37, %c128_38], %77 {strides = array<i32>} : memref<8x1024xbf16, #tpu.memory_space<vmem>>, vector<8x768xbf16>,
    %c0_39 = arith.constant 0 : index
    %c0_40 = arith.constant 0 : index
    %79 = vector.load %arg3[%c0_39, %c0_40] : memref<8x72xbf16, #tpu.memory_space<vmem>>, vector<8x72xbf16>
    %c0_41 = arith.constant 0 : index
    %c0_42 = arith.constant 0 : index
    %80 = vector.load %arg7[%c0_41, %c0_42] : memref<8x1xf32, #tpu.memory_space<vmem>>, vector<8x1xf32>
    %c0_43 = arith.constant 0 : index
    %c0_44 = arith.constant 0 : index
    %81 = vector.load %arg8[%c0_43, %c0_44] : memref<8x1xf32, #tpu.memory_space<vmem>>, vector<8x1xf32>
    %cst_45 = arith.constant 0.000000e+00 : f32
    %82 = vector.broadcast %cst_45 : f32 to vector<8x768xf32>
    %83 = vector.extract_strided_slice %79 {offsets = [0, 0], sizes = [8, 8], strides = [1, 1]} : vector<8x72xbf16> to vector<8x8xbf16>
    %c0_46 = arith.constant 0 : index
    %c109_47 = arith.constant 109 : index
    %84 = vector.load %arg10[%c0_46, %c109_47] : memref<8x1024xbf16, #tpu.memory_space<vmem>>, vector<8x768xbf16>
    %cst_48 = arith.constant dense<0.000000e+00> : vector<8x768xf32>
    %85 = tpu.matmul %83, %84, %cst_48 {dimension_numbers = #tpu.dot_dimension_numbers<[1], [0], [0], [1], [0, 0, 1, 1], [], []>} : vector<8x8xbf16>, vector<8x768xbf16>, vector<8x768xf32> -> vector<8x768xf32>
    %86 = arith.addf %82, %85 : vector<8x768xf32>
    %87 = vector.extract_strided_slice %79 {offsets = [0, 8], sizes = [8, 8], strides = [1, 1]} : vector<8x72xbf16> to vector<8x8xbf16>
    %c0_49 = arith.constant 0 : index
    %c110_50 = arith.constant 110 : index
    %88 = vector.load %arg10[%c0_49, %c110_50] : memref<8x1024xbf16, #tpu.memory_space<vmem>>, vector<8x768xbf16>
    %cst_51 = arith.constant dense<0.000000e+00> : vector<8x768xf32>
    %89 = tpu.matmul %87, %88, %cst_51 {dimension_numbers = #tpu.dot_dimension_numbers<[1], [0], [0], [1], [0, 0, 1, 1], [], []>} : vector<8x8xbf16>, vector<8x768xbf16>, vector<8x768xf32> -> vector<8x768xf32>
    %90 = arith.addf %86, %89 : vector<8x768xf32>
    %91 = vector.extract_strided_slice %79 {offsets = [0, 16], sizes = [8, 8], strides = [1, 1]} : vector<8x72xbf16> to vector<8x8xbf16>
    %c0_52 = arith.constant 0 : index
    %c111_53 = arith.constant 111 : index
    %92 = vector.load %arg10[%c0_52, %c111_53] : memref<8x1024xbf16, #tpu.memory_space<vmem>>, vector<8x768xbf16>
    %cst_54 = arith.constant dense<0.000000e+00> : vector<8x768xf32>
    %93 = tpu.matmul %91, %92, %cst_54 {dimension_numbers = #tpu.dot_dimension_numbers<[1], [0], [0], [1], [0, 0, 1, 1], [], []>} : vector<8x8xbf16>, vector<8x768xbf16>, vector<8x768xf32> -> vector<8x768xf32>
    %94 = arith.addf %90, %93 : vector<8x768xf32>
    %95 = vector.extract_strided_slice %79 {offsets = [0, 24], sizes = [8, 8], strides = [1, 1]} : vector<8x72xbf16> to vector<8x8xbf16>
    %c0_55 = arith.constant 0 : index
    %c127_56 = arith.constant 127 : index
    %96 = vector.load %arg10[%c0_55, %c127_56] : memref<8x1024xbf16, #tpu.memory_space<vmem>>, vector<8x768xbf16>
    %cst_57 = arith.constant dense<0.000000e+00> : vector<8x768xf32>
    %97 = tpu.matmul %95, %96, %cst_57 {dimension_numbers = #tpu.dot_dimension_numbers<[1], [0], [0], [1], [0, 0, 1, 1], [], []>} : vector<8x8xbf16>, vector<8x768xbf16>, vector<8x768xf32> -> vector<8x768xf32>
    %98 = arith.addf %94, %97 : vector<8x768xf32>
    %99 = vector.extract_strided_slice %79 {offsets = [0, 32], sizes = [8, 8], strides = [1, 1]} : vector<8x72xbf16> to vector<8x8xbf16>
    %c0_58 = arith.constant 0 : index
    %c128_59 = arith.constant 128 : index
    %100 = vector.load %arg10[%c0_58, %c128_59] : memref<8x1024xbf16, #tpu.memory_space<vmem>>, vector<8x768xbf16>
    %cst_60 = arith.constant dense<0.000000e+00> : vector<8x768xf32>
    %101 = tpu.matmul %99, %100, %cst_60 {dimension_numbers = #tpu.dot_dimension_numbers<[1], [0], [0], [1], [0, 0, 1, 1], [], []>} : vector<8x8xbf16>, vector<8x768xbf16>, vector<8x768xf32> -> vector<8x768xf32>
    %102 = arith.addf %98, %101 : vector<8x768xf32>
    %103 = vector.extract_strided_slice %79 {offsets = [0, 40], sizes = [8, 8], strides = [1, 1]} : vector<8x72xbf16> to vector<8x8xbf16>
    %c0_61 = arith.constant 0 : index
    %c129_62 = arith.constant 129 : index
    %104 = vector.load %arg10[%c0_61, %c129_62] : memref<8x1024xbf16, #tpu.memory_space<vmem>>, vector<8x768xbf16>
    %cst_63 = arith.constant dense<0.000000e+00> : vector<8x768xf32>
    %105 = tpu.matmul %103, %104, %cst_63 {dimension_numbers = #tpu.dot_dimension_numbers<[1], [0], [0], [1], [0, 0, 1, 1], [], []>} : vector<8x8xbf16>, vector<8x768xbf16>, vector<8x768xf32> -> vector<8x768xf32>
    %106 = arith.addf %102, %105 : vector<8x768xf32>
    %107 = vector.extract_strided_slice %79 {offsets = [0, 48], sizes = [8, 8], strides = [1, 1]} : vector<8x72xbf16> to vector<8x8xbf16>
    %c0_64 = arith.constant 0 : index
    %c145_65 = arith.constant 145 : index
    %108 = vector.load %arg10[%c0_64, %c145_65] : memref<8x1024xbf16, #tpu.memory_space<vmem>>, vector<8x768xbf16>
    %cst_66 = arith.constant dense<0.000000e+00> : vector<8x768xf32>
    %109 = tpu.matmul %107, %108, %cst_66 {dimension_numbers = #tpu.dot_dimension_numbers<[1], [0], [0], [1], [0, 0, 1, 1], [], []>} : vector<8x8xbf16>, vector<8x768xbf16>, vector<8x768xf32> -> vector<8x768xf32>
    %110 = arith.addf %106, %109 : vector<8x768xf32>
    %111 = vector.extract_strided_slice %79 {offsets = [0, 56], sizes = [8, 8], strides = [1, 1]} : vector<8x72xbf16> to vector<8x8xbf16>
    %c0_67 = arith.constant 0 : index
    %c146_68 = arith.constant 146 : index
    %112 = vector.load %arg10[%c0_67, %c146_68] : memref<8x1024xbf16, #tpu.memory_space<vmem>>, vector<8x768xbf16>
    %cst_69 = arith.constant dense<0.000000e+00> : vector<8x768xf32>
    %113 = tpu.matmul %111, %112, %cst_69 {dimension_numbers = #tpu.dot_dimension_numbers<[1], [0], [0], [1], [0, 0, 1, 1], [], []>} : vector<8x8xbf16>, vector<8x768xbf16>, vector<8x768xf32> -> vector<8x768xf32>
    %114 = arith.addf %110, %113 : vector<8x768xf32>
    %115 = vector.extract_strided_slice %79 {offsets = [0, 64], sizes = [8, 8], strides = [1, 1]} : vector<8x72xbf16> to vector<8x8xbf16>
    %c0_70 = arith.constant 0 : index
    %c147_71 = arith.constant 147 : index
    %116 = vector.load %arg10[%c0_70, %c147_71] : memref<8x1024xbf16, #tpu.memory_space<vmem>>, vector<8x768xbf16>
    %cst_72 = arith.constant dense<0.000000e+00> : vector<8x768xf32>
    %117 = tpu.matmul %115, %116, %cst_72 {dimension_numbers = #tpu.dot_dimension_numbers<[1], [0], [0], [1], [0, 0, 1, 1], [], []>} : vector<8x8xbf16>, vector<8x768xbf16>, vector<8x768xf32> -> vector<8x768xf32>
    %118 = arith.addf %114, %117 : vector<8x768xf32>
    %119 = vector.broadcast %0 : vector<1x768xf32> to vector<8x768xf32>
    %120 = arith.mulf %118, %119 : vector<8x768xf32>
    %cst_73 = arith.constant dense<0.000000e+00> : vector<8xf32>
    %121 = vector.multi_reduction <add>, %120, %cst_73 [1] : vector<8x768xf32> to vector<8xf32>
    %122 = vector.shape_cast %121 : vector<8xf32> to vector<8x1xf32>
    %cst_74 = arith.constant 0.001953125 : f32
    %123 = vector.broadcast %cst_74 : f32 to vector<8x1xf32>
    %124 = arith.mulf %122, %123 : vector<8x1xf32>
    %125 = vector.broadcast %124 : vector<8x1xf32> to vector<8x768xf32>
    %126 = arith.subf %118, %125 : vector<8x768xf32>
    %127 = vector.broadcast %0 : vector<1x768xf32> to vector<8x768xf32>
    %128 = arith.mulf %126, %127 : vector<8x768xf32>
    %129 = arith.mulf %128, %128 : vector<8x768xf32>
    %cst_75 = arith.constant dense<0.000000e+00> : vector<8xf32>
    %130 = vector.multi_reduction <add>, %129, %cst_75 [1] : vector<8x768xf32> to vector<8xf32>
    %131 = vector.shape_cast %130 : vector<8xf32> to vector<8x1xf32>
    %cst_76 = arith.constant 0.001953125 : f32
    %132 = vector.broadcast %cst_76 : f32 to vector<8x1xf32>
    %133 = arith.mulf %131, %132 : vector<8x1xf32>
    %cst_77 = arith.constant 9.99999974E-6 : f32
    %134 = vector.broadcast %cst_77 : f32 to vector<8x1xf32>
    %135 = arith.addf %133, %134 : vector<8x1xf32>
    %136 = math.rsqrt %135 : vector<8x1xf32>
    %137 = arith.mulf %80, %136 : vector<8x1xf32>
    %138 = arith.mulf %124, %137 : vector<8x1xf32>
    %139 = arith.subf %81, %138 : vector<8x1xf32>
    %140 = vector.broadcast %137 : vector<8x1xf32> to vector<8x768xf32>
    %141 = arith.mulf %118, %140 : vector<8x768xf32>
    %142 = vector.broadcast %139 : vector<8x1xf32> to vector<8x768xf32>
    %143 = arith.addf %141, %142 : vector<8x768xf32>
    %cst_78 = arith.constant 0.000000e+00 : f32
    %144 = vector.broadcast %cst_78 : f32 to vector<8x768xf32>
    %145 = arith.cmpf ogt, %143, %144 : vector<8x768xf32>
    %cst_79 = arith.constant 0.00999999977 : f32
    %146 = vector.broadcast %cst_79 : f32 to vector<8x768xf32>
    %147 = arith.mulf %146, %143 : vector<8x768xf32>
    %148 = arith.select %145, %143, %147 : vector<8x768xi1>, vector<8x768xf32>
    %149 = vector.broadcast %0 : vector<1x768xf32> to vector<8x768xf32>
    %150 = arith.mulf %148, %149 : vector<8x768xf32>
    %c0_80 = arith.constant 0 : index
    %c0_81 = arith.constant 0 : index
    %151 = vector.load %arg9[%c0_80, %c0_81] : memref<8x768xf32, #tpu.memory_space<vmem>>, vector<8x768xf32>
    tpu.vector_store %arg9[%c0_80, %c0_81], %150 {strides = array<i32>} : memref<8x768xf32, #tpu.memory_space<vmem>>, vector<8x768xf32>,
    return
  }
  func.func @transform_0(%arg0: i32) -> (i32, i32) {
    %c0_i32 = arith.constant 0 : i32
    %c0_i32_0 = arith.constant 0 : i32
    %c0_i32_1 = arith.constant 0 : i32
    return %c0_i32, %c0_i32_0 : i32, i32
  }
  func.func @transform_1(%arg0: i32) -> (i32, i32) {
    %c0_i32 = arith.constant 0 : i32
    %c0_i32_0 = arith.constant 0 : i32
    %c0_i32_1 = arith.constant 0 : i32
    return %c0_i32, %c0_i32_0 : i32, i32
  }
  func.func @transform_2(%arg0: i32) -> (i32, i32) {
    %c0_i32 = arith.constant 0 : i32
    %c0_i32_0 = arith.constant 0 : i32
    %c0_i32_1 = arith.constant 0 : i32
    return %c0_i32, %c0_i32_0 : i32, i32
  }
  func.func @transform_3(%arg0: i32) -> (i32, i32) {
    %c0_i32 = arith.constant 0 : i32
    %c0_i32_0 = arith.constant 0 : i32
    %c0_i32_1 = arith.constant 0 : i32
    return %c0_i32, %c0_i32_0 : i32, i32
  }
  func.func @transform_4(%arg0: i32) -> (i32, i32) {
    %c0_i32 = arith.constant 0 : i32
    %c0_i32_0 = arith.constant 0 : i32
    %c0_i32_1 = arith.constant 0 : i32
    return %c0_i32, %c0_i32_0 : i32, i32
  }
  func.func @transform_5(%arg0: i32) -> (i32, i32) {
    %c0_i32 = arith.constant 0 : i32
    %c0_i32_0 = arith.constant 0 : i32
    %c0_i32_1 = arith.constant 0 : i32
    return %c0_i32, %c0_i32_0 : i32, i32
  }
  func.func @transform_6(%arg0: i32) -> (i32, i32) {
    %c0_i32 = arith.constant 0 : i32
    %c0_i32_0 = arith.constant 0 : i32
    %c0_i32_1 = arith.constant 0 : i32
    return %c0_i32, %c0_i32_0 : i32, i32
  }
  func.func @transform_7(%arg0: i32) -> (i32, i32) {
    %c0_i32 = arith.constant 0 : i32
    %c0_i32_0 = arith.constant 0 : i32
    %c0_i32_1 = arith.constant 0 : i32
    return %c0_i32, %c0_i32_0 : i32, i32
  }
  func.func @transform_8(%arg0: i32) -> (i32, i32) {
    %c0_i32 = arith.constant 0 : i32
    %c0_i32_0 = arith.constant 0 : i32
    %c0_i32_1 = arith.constant 0 : i32
    return %c0_i32, %c0_i32_0 : i32, i32
  }
}

</mosaic_0001>

<bundles_post_ra>
// kernel: up_forward.1
= control target key start
LH: loop header
LB: loop body
LE: loop exit
PB: predicated region body
PF: predicated region fallthrough
CT: control target
= control target key end

     0   :  { %v3666_v2 = vmov 0   ;;  %s3667_s9 = smov 18   ;;  %s3668_s14 = smov 120   ;;  %vm75_vm0 = vcmask 146432   ;;  %vm86_vm1 = vcmask 1043456   ;;  %vm82_vm2 = vcmask 64512   ;;  %s4565_s0 = inlined_call_operand.vmem [shape: bf16[8,1024], index: 0, kind: input, shape index: {}]   ;;  %s4566_s1 = inlined_call_operand.vmem [shape: bf16[8,72], index: 1, kind: input, shape index: {}]   ;;  %s4567_s3 = inlined_call_operand.vmem [shape: f32[1,768], index: 3, kind: input, shape index: {}]   ;;  %s4568_s4 = inlined_call_operand.vmem [shape: f32[8,1], index: 4, kind: input, shape index: {}]   ;;  %s4569_s5 = inlined_call_operand.vmem [shape: f32[8,1], index: 5, kind: input, shape index: {}]   ;;  %s4570_s2 = inlined_call_operand.vmem [shape: bf16[8,72], index: 2, kind: input, shape index: {}]   ;;  %s4571_s6 = inlined_call_operand.vmem [shape: f32[8,1], index: 6, kind: input, shape index: {}]   ;;  %s4572_s7 = inlined_call_operand.vmem [shape: f32[8,1], index: 7, kind: input, shape index: {}]   ;;  %s4573_s8 = inlined_call_operand.vmem [shape: f32[8,768], index: 8, kind: output, shape index: {}]  }
   0x1   :  { %v35_v0 = vld [vmem:[%s4565_s0 + $0x8] sm:$0xff]  ;;  %v34_v1 = vld [vmem:[%s4565_s0] sm:$0xff]  ;;  %137 = vmatprep.mubr.bf16.mxu0 %v3666_v2  ;;  %1745 = vst [vmem:[#allocation2] sm:$0xf] %v3666_v2  ;;  %1746 = vst [vmem:[#allocation2 + $0x1c] sm:$0xf] %v3666_v2  ;;  %178 = vmatprep.mubr.bf16.mxu1 %v3666_v2 }
   0x2   :  { %v3460_v3 = vcombine.low %v35_v0, %v35_v0  ;;  %v3458_v4 = vcombine.low %v34_v1, %v34_v1  ;;  %3630 = vset.pattern.permute.xlu0 %v3666_v2  ;;  %3631 = vset.pattern.permute.xlu1 %v3666_v2  ;;  %v3461_v5 = vcombine.high %v35_v0, %v35_v0  ;;  %v3745_v7 = vld [vmem:[%s4566_s1] sm:$0xf]  ;;  %v36_v8 = vld [vmem:[%s4565_s0 + $0x10] sm:$0xff]  ;;  %v3638_v11 = vld [vmem:[%s4565_s0 + $0x18] ss:$0 sps:$4 sm:$0xff]   ;;  %s3669_s16 = smov 19  }
   0x3   :  { %v3459_v6 = vcombine.high %v34_v1, %v34_v1  ;;  %v3754_v9 = vcombine.low %v3745_v7, %v3745_v7  ;;  %v3462_v10 = vcombine.low %v36_v8, %v36_v8  ;;  %v3463_v12 = vcombine.high %v36_v8, %v36_v8  ;;  %s3670_s17 = smov 17   ;;  %s3671_s18 = smov 112   ;;  %v909_v13 = vld [vmem:[%s4565_s0 + $0x4] sm:$0xff]  ;;  %v910_v16 = vld [vmem:[%s4565_s0 + $0xc] sm:$0xff]  ;;  %v911_v19 = vld [vmem:[%s4565_s0 + $0x14] sm:$0xff] }
   0x4   :  { %65 = vrot.lane.b32.xlu1 %v3460_v3, %s3667_s9  ;;  %61 = vrot.lane.b32.xlu0 %v3458_v4, %s3667_s9  ;;  %s3672_s19 = smov 1   ;;  %s3673_s20 = smov 104   ;;  %v3794_v14 = vcombine.high %v909_v13, %v909_v13  ;;  %v3796_v15 = vcombine.low %v909_v13, %v909_v13  ;;  %v3805_v17 = vcombine.high %v910_v16, %v910_v16  ;;  %v3645_v21 = vld [vmem:[%s4565_s0 + $0x1c] ss:$0 sps:$4 sm:$0xff]   ;;  %vm242_vm3 = vcmask 154624  }
   0x5   :  { %s3674_s23 = smov 96   ;;  %s3675_s26 = smov 127   ;;  %v3807_v18 = vcombine.low %v910_v16, %v910_v16  ;;  %v3816_v20 = vcombine.low %v911_v19, %v911_v19  ;;  %v3825_v22 = vcombine.high %v911_v19, %v911_v19  ;;  %vm409_vm4 = vcmask 138240  }
   0x6   :  { %s3676_s29 = smov 88   ;;  %s3677_s11 = smov 111   ;;  %vm582_vm5 = vcmask 7168   ;;  %vm947_vm6 = vcmask 1039360   ;;  %vm1120_vm7 = vcmask 908288   ;;  %vm1293_vm8 = vcmask 900096  }
   0x7   :  { %s3678_s0 = smov 80   ;;  %s3679_s12 = smov 110   ;;  %vm1466_vm9 = vcmask 891904  }
   0x8   :  { %67 = vrot.lane.b32.xlu1 %v3461_v5, %s3667_s9  ;;  %63 = vrot.lane.b32.xlu0 %v3459_v6, %s3667_s9  ;;  %s3680_s13 = smov 72   ;;  %s3681_s1 = smov 109  }
   0x9   :  { %s3682_s15 = smov 64  }
   0xc   :  { %41 = vrot.lane.b32.xlu1 %v3754_v9, %s3668_s14  ;;  %69 = vrot.lane.b32.xlu0 %v3462_v10, %s3667_s9 }
  0x10   :  { %73 = vrot.lane.b32.xlu1 %v3638_v11, %s3667_s9  ;;  %71 = vrot.lane.b32.xlu0 %v3463_v12, %s3667_s9 }
  0x14   :  { %230 = vrot.lane.b32.xlu1 %v3459_v6, %s3669_s16  ;;  %228 = vrot.lane.b32.xlu0 %v3458_v4, %s3669_s16 }
  0x18   :  { %234 = vrot.lane.b32.xlu1 %v3461_v5, %s3669_s16  ;;  %232 = vrot.lane.b32.xlu0 %v3460_v3, %s3669_s16 }
  0x1c   :  { %238 = vrot.lane.b32.xlu1 %v3463_v12, %s3669_s16  ;;  %236 = vrot.lane.b32.xlu0 %v3462_v10, %s3669_s16 }
  0x20   :  { %395 = vrot.lane.b32.xlu1 %v3458_v4, %s3670_s17  ;;  %240 = vrot.lane.b32.xlu0 %v3638_v11, %s3669_s16 }
  0x24   :  { %399 = vrot.lane.b32.xlu1 %v3460_v3, %s3670_s17  ;;  %397 = vrot.lane.b32.xlu0 %v3459_v6, %s3670_s17 }
  0x28   :  { %403 = vrot.lane.b32.xlu1 %v3462_v10, %s3670_s17  ;;  %401 = vrot.lane.b32.xlu0 %v3461_v5, %s3670_s17 }
  0x2c   :  { %405 = vrot.lane.b32.xlu1 %v3463_v12, %s3670_s17  ;;  %393 = vrot.lane.b32.xlu0 %v3754_v9, %s3671_s18 }
  0x30   :  { %568 = vrot.lane.b32.xlu1 %v3458_v4, %s3672_s19  ;;  %407 = vrot.lane.b32.xlu0 %v3638_v11, %s3670_s17 }
  0x34   :  { %572 = vrot.lane.b32.xlu1 %v3460_v3, %s3672_s19  ;;  %570 = vrot.lane.b32.xlu0 %v3459_v6, %s3672_s19 }
  0x38   :  { %576 = vrot.lane.b32.xlu1 %v3462_v10, %s3672_s19  ;;  %574 = vrot.lane.b32.xlu0 %v3461_v5, %s3672_s19 }
  0x3c   :  { %578 = vrot.lane.b32.xlu1 %v3463_v12, %s3672_s19  ;;  %566 = vrot.lane.b32.xlu0 %v3754_v9, %s3673_s20 }
  0x40   :  { %742 = vrot.lane.b32.xlu1 %v3754_v9, %s3674_s23  ;;  %580 = vrot.lane.b32.xlu0 %v3638_v11, %s3672_s19 }
  0x44   :  { %935 = vrot.lane.b32.xlu1 %v3794_v14, %s3675_s26  ;;  %933 = vrot.lane.b32.xlu0 %v3796_v15, %s3675_s26 }
  0x48   :  { %939 = vrot.lane.b32.xlu1 %v3805_v17, %s3675_s26  ;;  %937 = vrot.lane.b32.xlu0 %v3807_v18, %s3675_s26 }
  0x4c   :  { %913 = vrot.lane.b32.xlu1 %v3754_v9, %s3676_s29  ;;  %941 = vrot.lane.b32.xlu0 %v3816_v20, %s3675_s26 }
  0x50   :  { %945 = vrot.lane.b32.xlu1 %v3645_v21, %s3675_s26  ;;  %943 = vrot.lane.b32.xlu0 %v3825_v22, %s3675_s26 }
  0x54   :  { %1108 = vrot.lane.b32.xlu1 %v3794_v14, %s3677_s11  ;;  %1106 = vrot.lane.b32.xlu0 %v3796_v15, %s3677_s11 }
  0x58   :  { %1112 = vrot.lane.b32.xlu1 %v3805_v17, %s3677_s11  ;;  %1110 = vrot.lane.b32.xlu0 %v3807_v18, %s3677_s11 }
  0x5c   :  { %1104 = vrot.lane.b32.xlu1 %v3754_v9, %s3678_s0  ;;  %1114 = vrot.lane.b32.xlu0 %v3816_v20, %s3677_s11 }
  0x60   :  { %1118 = vrot.lane.b32.xlu1 %v3645_v21, %s3677_s11  ;;  %1116 = vrot.lane.b32.xlu0 %v3825_v22, %s3677_s11 }
  0x64   :  { %1281 = vrot.lane.b32.xlu1 %v3794_v14, %s3679_s12  ;;  %1279 = vrot.lane.b32.xlu0 %v3796_v15, %s3679_s12 }
  0x68   :  { %1285 = vrot.lane.b32.xlu1 %v3805_v17, %s3679_s12  ;;  %1283 = vrot.lane.b32.xlu0 %v3807_v18, %s3679_s12 }
  0x6c   :  { %1277 = vrot.lane.b32.xlu1 %v3754_v9, %s3680_s13  ;;  %1287 = vrot.lane.b32.xlu0 %v3816_v20, %s3679_s12 }
  0x70   :  { %1291 = vrot.lane.b32.xlu1 %v3645_v21, %s3679_s12  ;;  %1289 = vrot.lane.b32.xlu0 %v3825_v22, %s3679_s12 }
  0x74   :  { %1454 = vrot.lane.b32.xlu1 %v3794_v14, %s3681_s1  ;;  %1452 = vrot.lane.b32.xlu0 %v3796_v15, %s3681_s1 }
  0x76   :  { %v66_v23 = vpop.permute.xlu1 %65  ;;  %v62_v24 = vpop.permute.xlu0 %61 }
  0x78   :  { %1458 = vrot.lane.b32.xlu1 %v3805_v17, %s3681_s1  ;;  %1456 = vrot.lane.b32.xlu0 %v3807_v18, %s3681_s1 }
  0x7a   :  { %v68_v25 = vpop.permute.xlu1 %67  ;;  %v64_v26 = vpop.permute.xlu0 %63 }
  0x7b   :  { %v77_v27 = vsel %vm75_vm0, %v64_v26, %v66_v23  ;;  %v76_v28 = vsel %vm75_vm0, %v62_v24, %v64_v26  ;;  %v78_v32 = vsel %vm75_vm0, %v66_v23, %v68_v25 }
  0x7c   :  { %1450 = vrot.lane.b32.xlu1 %v3754_v9, %s3682_s15  ;;  %1460 = vrot.lane.b32.xlu0 %v3816_v20, %s3681_s1  ;;  %v88_v29 = vsel %vm86_vm1, %v76_v28, 0  ;;  %v94_v34 = vsel %vm86_vm1, %v78_v32, 0 }
  0x7d   :  { %3465 = vmatprep.subr.msk.bf16.mxu0 %vm86_vm1, %v77_v27 }
  0x7e   :  { %120 = vmatpush1.bf16.msra.mxu0 %v88_v29  ;;  %v42_v30 = vpop.permute.xlu1 %41  ;;  %v70_v31 = vpop.permute.xlu0 %69  ;;  %v763_v29 = vsel %vm86_vm1, %v3796_v15, 0 }
  0x7f   :  { %v79_v33 = vsel %vm75_vm0, %v68_v25, %v70_v31 }
  0x80   :  { %1464 = vrot.lane.b32.xlu1 %v3645_v21, %s3681_s1  ;;  %1462 = vrot.lane.b32.xlu0 %v3825_v22, %s3681_s1 }
  0x81   :  { %3466 = vmatmul.mubr.msk.bf16.vlgmr.msra.gmra.mxu0 %vm82_vm2, %v42_v30  ;;  %3467 = vmatprep.subr.msk.bf16.mxu1 %vm86_vm1, %v79_v33 }
  0x82   :  { %161 = vmatpush1.bf16.msra.mxu1 %v94_v34  ;;  %v74_v35 = vpop.permute.xlu1 %73  ;;  %v72_v36 = vpop.permute.xlu0 %71  ;;  %219 = vmatprep.mubr.bf16.mxu0 %v3666_v2 }
  0x83   :  { %v80_v37 = vsel %vm75_vm0, %v70_v31, %v72_v36  ;;  %v81_v38 = vsel %vm75_vm0, %v72_v36, %v74_v35  ;;  %v769_v35 = vsel %vm86_vm1, %v3807_v18, 0  ;;  %v775_v36 = vsel %vm86_vm1, %v3816_v20, 0 }
  0x84   :  { %3469 = vmatprep.subr.msk.bf16.mxu0 %vm86_vm1, %v81_v38  ;;  %v100_v39 = vsel %vm86_vm1, %v80_v37, 0 }
  0x85   :  { %3468 = vmatmul.mubr.msk.bf16.vlgmr.msra.gmra.mxu1 %vm82_vm2, %v42_v30  ;;  %202 = vmatpush1.bf16.msra.mxu0 %v100_v39 }
  0x86   :  { %v231_v40 = vpop.permute.xlu1 %230  ;;  %v229_v41 = vpop.permute.xlu0 %228  ;;  %302 = vmatprep.mubr.bf16.mxu1 %v3666_v2 }
  0x87   :  { %v243_v42 = vsel %vm242_vm3, %v229_v41, %v231_v40 }
  0x88   :  { %v253_v46 = vsel %vm86_vm1, %v243_v42, 0 }
  0x89   :  { %3470 = vmatmul.mubr.msk.bf16.vlgmr.msra.gmra.mxu0 %vm82_vm2, %v42_v30 }
  0x8a   :  { %v235_v43 = vpop.permute.xlu1 %234  ;;  %v233_v44 = vpop.permute.xlu0 %232  ;;  %343 = vmatprep.mubr.bf16.mxu0 %v3666_v2 }
  0x8b   :  { %v244_v45 = vsel %vm242_vm3, %v231_v40, %v233_v44  ;;  %v245_v47 = vsel %vm242_vm3, %v233_v44, %v235_v43 }
  0x8c   :  { %3471 = vmatprep.subr.msk.bf16.mxu1 %vm86_vm1, %v244_v45  ;;  %v259_v51 = vsel %vm86_vm1, %v245_v47, 0 }
  0x8d   :  { %285 = vmatpush1.bf16.msra.mxu1 %v253_v46 }
  0x8e   :  { %v239_v48 = vpop.permute.xlu1 %238  ;;  %v237_v49 = vpop.permute.xlu0 %236 }
  0x8f   :  { %v246_v50 = vsel %vm242_vm3, %v235_v43, %v237_v49  ;;  %v247_v52 = vsel %vm242_vm3, %v237_v49, %v239_v48 }
  0x90   :  { %3472 = vmatmul.mubr.msk.bf16.vlgmr.msra.gmra.mxu1 %vm82_vm2, %v3745_v7  ;;  %3473 = vmatprep.subr.msk.bf16.mxu0 %vm86_vm1, %v246_v50  ;;  %v265_v56 = vsel %vm86_vm1, %v247_v52, 0 }
  0x91   :  { %326 = vmatpush1.bf16.msra.mxu0 %v259_v51  ;;  %384 = vmatprep.mubr.bf16.mxu1 %v3666_v2 }
  0x92   :  { %v396_v53 = vpop.permute.xlu1 %395  ;;  %v241_v54 = vpop.permute.xlu0 %240 }
  0x93   :  { %v248_v55 = vsel %vm242_vm3, %v239_v48, %v241_v54 }
  0x94   :  { %3474 = vmatmul.mubr.msk.bf16.vlgmr.msra.gmra.mxu0 %vm82_vm2, %v3745_v7  ;;  %3475 = vmatprep.subr.msk.bf16.mxu1 %vm86_vm1, %v248_v55 }
  0x95   :  { %367 = vmatpush1.bf16.msra.mxu1 %v265_v56  ;;  %469 = vmatprep.mubr.bf16.mxu0 %v3666_v2 }
  0x96   :  { %v400_v57 = vpop.permute.xlu1 %399  ;;  %v398_v58 = vpop.permute.xlu0 %397 }
  0x97   :  { %v410_v59 = vsel %vm409_vm4, %v396_v53, %v398_v58  ;;  %v411_v60 = vsel %vm409_vm4, %v398_v58, %v400_v57 }
  0x98   :  { %3476 = vmatmul.mubr.msk.bf16.vlgmr.msra.gmra.mxu1 %vm82_vm2, %v3745_v7  ;;  %3477 = vmatprep.subr.msk.bf16.mxu0 %vm86_vm1, %v411_v60  ;;  %v420_v61 = vsel %vm86_vm1, %v410_v59, 0 }
  0x99   :  { %452 = vmatpush1.bf16.msra.mxu0 %v420_v61  ;;  %510 = vmatprep.mubr.bf16.mxu1 %v3666_v2 }
  0x9a   :  { %v404_v62 = vpop.permute.xlu1 %403  ;;  %v402_v63 = vpop.permute.xlu0 %401 }
  0x9b   :  { %v412_v0 = vsel %vm409_vm4, %v400_v57, %v402_v63  ;;  %v413_v1 = vsel %vm409_vm4, %v402_v63, %v404_v62 }
  0x9c   :  { %3479 = vmatprep.subr.msk.bf16.mxu1 %vm86_vm1, %v413_v1  ;;  %v426_v3 = vsel %vm86_vm1, %v412_v0, 0 }
  0x9d   :  { %493 = vmatpush1.bf16.msra.mxu1 %v426_v3 }
  0x9e   :  { %v406_v4 = vpop.permute.xlu1 %405  ;;  %v394_v5 = vpop.permute.xlu0 %393 }
  0x9f   :  { %3478 = vmatmul.mubr.msk.bf16.vlgmr.msra.gmra.mxu0 %vm82_vm2, %v394_v5  ;;  %v414_v6 = vsel %vm409_vm4, %v404_v62, %v406_v4 }
  0xa0   :  { %3480 = vmatmul.mubr.msk.bf16.vlgmr.msra.gmra.mxu1 %vm82_vm2, %v394_v5  ;;  %551 = vmatprep.mubr.bf16.mxu0 %v3666_v2  ;;  %v432_v10 = vsel %vm86_vm1, %v414_v6, 0 }
  0xa1   :  { %642 = vmatprep.mubr.bf16.mxu1 %v3666_v2 }
  0xa2   :  { %v569_v7 = vpop.permute.xlu1 %568  ;;  %v408_v8 = vpop.permute.xlu0 %407 }
  0xa3   :  { %v415_v9 = vsel %vm409_vm4, %v406_v4, %v408_v8 }
  0xa4   :  { %3481 = vmatprep.subr.msk.bf16.mxu0 %vm86_vm1, %v415_v9 }
  0xa5   :  { %534 = vmatpush1.bf16.msra.mxu0 %v432_v10 }
  0xa6   :  { %v573_v11 = vpop.permute.xlu1 %572  ;;  %v571_v12 = vpop.permute.xlu0 %570 }
  0xa7   :  { %v583_v13 = vsel %vm582_vm5, %v569_v7, %v571_v12  ;;  %v584_v16 = vsel %vm582_vm5, %v571_v12, %v573_v11 }
  0xa8   :  { %3482 = vmatmul.mubr.msk.bf16.vlgmr.msra.gmra.mxu0 %vm82_vm2, %v394_v5  ;;  %3483 = vmatprep.subr.msk.bf16.mxu1 %vm86_vm1, %v584_v16  ;;  %v593_v19 = vsel %vm86_vm1, %v583_v13, 0 }
  0xa9   :  { %625 = vmatpush1.bf16.msra.mxu1 %v593_v19  ;;  %683 = vmatprep.mubr.bf16.mxu0 %v3666_v2 }
  0xaa   :  { %v577_v21 = vpop.permute.xlu1 %576  ;;  %v575_v23 = vpop.permute.xlu0 %574 }
  0xab   :  { %v585_v24 = vsel %vm582_vm5, %v573_v11, %v575_v23  ;;  %v586_v25 = vsel %vm582_vm5, %v575_v23, %v577_v21 }
  0xac   :  { %3485 = vmatprep.subr.msk.bf16.mxu0 %vm86_vm1, %v586_v25  ;;  %v599_v26 = vsel %vm86_vm1, %v585_v24, 0 }
  0xad   :  { %666 = vmatpush1.bf16.msra.mxu0 %v599_v26 }
  0xae   :  { %v579_v27 = vpop.permute.xlu1 %578  ;;  %v567_v28 = vpop.permute.xlu0 %566  ;;  %3495 = vmatprep.subr.msk.bf16.mxu0 %vm86_vm1, %v3794_v14 }
  0xaf   :  { %3484 = vmatmul.mubr.msk.bf16.vlgmr.msra.gmra.mxu1 %vm82_vm2, %v567_v28  ;;  %v587_v30 = vsel %vm582_vm5, %v577_v21, %v579_v27 }
  0xb0   :  { %3486 = vmatmul.mubr.msk.bf16.vlgmr.msra.gmra.mxu0 %vm82_vm2, %v567_v28  ;;  %724 = vmatprep.mubr.bf16.mxu1 %v3666_v2  ;;  %v605_v15 = vsel %vm86_vm1, %v587_v30, 0 }
  0xb1   :  { %795 = vmatpush1.bf16.msra.mxu0 %v763_v29  ;;  %812 = vmatprep.mubr.bf16.mxu0 %v3666_v2 }
  0xb2   :  { %v743_v31 = vpop.permute.xlu1 %742  ;;  %v581_v32 = vpop.permute.xlu0 %580  ;;  %3499 = vmatprep.subr.msk.bf16.mxu0 %vm86_vm1, %v3825_v22 }
  0xb3   :  { %v588_v14 = vsel %vm582_vm5, %v579_v27, %v581_v32 }
  0xb4   :  { %3487 = vmatprep.subr.msk.bf16.mxu1 %vm86_vm1, %v588_v14 }
  0xb5   :  { %707 = vmatpush1.bf16.msra.mxu1 %v605_v15 }
  0xb6   :  { %v936_v33 = vpop.permute.xlu1 %935  ;;  %v934_v34 = vpop.permute.xlu0 %933  ;;  %3497 = vmatprep.subr.msk.bf16.mxu1 %vm86_vm1, %v3805_v17 }
  0xb7   :  { %v948_v18 = vsel %vm947_vm6, %v934_v34, %v936_v33 }
  0xb8   :  { %3488 = vmatmul.mubr.msk.bf16.vlgmr.msra.gmra.mxu1 %vm82_vm2, %v567_v28  ;;  %3496 = vmatmul.mubr.msk.bf16.vlgmr.msra.gmra.mxu0 %vm82_vm2, %v743_v31  ;;  %v958_v41 = vsel %vm86_vm1, %v948_v18, 0 }
  0xb9   :  { %836 = vmatpush1.bf16.msra.mxu1 %v769_v35  ;;  %877 = vmatpush1.bf16.msra.mxu0 %v775_v36 }
  0xba   :  { %v940_v22 = vpop.permute.xlu1 %939  ;;  %v938_v37 = vpop.permute.xlu0 %937  ;;  %853 = vmatprep.mubr.bf16.mxu1 %v3666_v2  ;;  %894 = vmatprep.mubr.bf16.mxu0 %v3666_v2 }
  0xbb   :  { %v949_v17 = vsel %vm947_vm6, %v936_v33, %v938_v37  ;;  %v950_v20 = vsel %vm947_vm6, %v938_v37, %v940_v22 }
  0xbc   :  { %3508 = vmatprep.subr.msk.bf16.mxu1 %vm86_vm1, %v949_v17  ;;  %v964_v42 = vsel %vm86_vm1, %v950_v20, 0 }
  0xbe   :  { %v914_v38 = vpop.permute.xlu1 %913  ;;  %v942_v39 = vpop.permute.xlu0 %941 }
  0xbf   :  { %v951_v40 = vsel %vm947_vm6, %v940_v22, %v942_v39 }
  0xc0   :  { %3498 = vmatmul.mubr.msk.bf16.vlgmr.msra.gmra.mxu1 %vm82_vm2, %v743_v31  ;;  %3500 = vmatmul.mubr.msk.bf16.vlgmr.msra.gmra.mxu0 %vm82_vm2, %v743_v31 }
  0xc1   :  { %990 = vmatpush1.bf16.msra.mxu1 %v958_v41  ;;  %3510 = vmatprep.subr.msk.bf16.mxu0 %vm86_vm1, %v951_v40 }
  0xc2   :  { %1031 = vmatpush1.bf16.msra.mxu0 %v964_v42  ;;  %v946_v43 = vpop.permute.xlu1 %945  ;;  %v944_v44 = vpop.permute.xlu0 %943  ;;  %1007 = vmatprep.mubr.bf16.mxu1 %v3666_v2 }
  0xc3   :  { %v953_v45 = vsel %vm947_vm6, %v944_v44, %v946_v43  ;;  %1048 = vmatprep.mubr.bf16.mxu0 %v3666_v2  ;;  %v952_v46 = vsel %vm947_vm6, %v942_v39, %v944_v44 }
  0xc4   :  { %3512 = vmatprep.subr.msk.bf16.mxu1 %vm86_vm1, %v953_v45  ;;  %v970_v49 = vsel %vm86_vm1, %v952_v46, 0 }
  0xc6   :  { %v1109_v47 = vpop.permute.xlu1 %1108  ;;  %v1107_v48 = vpop.permute.xlu0 %1106 }
  0xc7   :  { %v1121_v50 = vsel %vm1120_vm7, %v1107_v48, %v1109_v47 }
  0xc8   :  { %3509 = vmatmul.mubr.msk.bf16.vlgmr.msra.gmra.mxu1 %vm82_vm2, %v914_v38  ;;  %3511 = vmatmul.mubr.msk.bf16.vlgmr.msra.gmra.mxu0 %vm82_vm2, %v914_v38  ;;  %v1131_v54 = vsel %vm86_vm1, %v1121_v50, 0 }
  0xc9   :  { %1072 = vmatpush1.bf16.msra.mxu1 %v970_v49  ;;  %1089 = vmatprep.mubr.bf16.mxu1 %v3666_v2 }
  0xca   :  { %v1113_v51 = vpop.permute.xlu1 %1112  ;;  %v1111_v52 = vpop.permute.xlu0 %1110  ;;  %1180 = vmatprep.mubr.bf16.mxu0 %v3666_v2 }
  0xcb   :  { %v1122_v53 = vsel %vm1120_vm7, %v1109_v47, %v1111_v52  ;;  %v1123_v55 = vsel %vm1120_vm7, %v1111_v52, %v1113_v51 }
  0xcc   :  { %3514 = vmatprep.subr.msk.bf16.mxu0 %vm86_vm1, %v1122_v53  ;;  %v1137_v59 = vsel %vm86_vm1, %v1123_v55, 0 }
  0xcd   :  { %1163 = vmatpush1.bf16.msra.mxu0 %v1131_v54 }
  0xce   :  { %v1105_v56 = vpop.permute.xlu1 %1104  ;;  %v1115_v57 = vpop.permute.xlu0 %1114 }
  0xcf   :  { %v1124_v58 = vsel %vm1120_vm7, %v1113_v51, %v1115_v57 }
  0xd0   :  { %3513 = vmatmul.mubr.msk.bf16.vlgmr.msra.gmra.mxu1 %vm82_vm2, %v914_v38  ;;  %3515 = vmatmul.mubr.msk.bf16.vlgmr.msra.gmra.mxu0 %vm82_vm2, %v1105_v56 }
  0xd1   :  { %3516 = vmatprep.subr.msk.bf16.mxu1 %vm86_vm1, %v1124_v58  ;;  %1221 = vmatprep.mubr.bf16.mxu1 %v3666_v2 }
  0xd2   :  { %1204 = vmatpush1.bf16.msra.mxu1 %v1137_v59  ;;  %v1119_v60 = vpop.permute.xlu1 %1118  ;;  %v1117_v61 = vpop.permute.xlu0 %1116  ;;  %1262 = vmatprep.mubr.bf16.mxu0 %v3666_v2 }
  0xd3   :  { %v1125_v62 = vsel %vm1120_vm7, %v1115_v57, %v1117_v61  ;;  %v1126_v63 = vsel %vm1120_vm7, %v1117_v61, %v1119_v60 }
  0xd4   :  { %v1143_v0 = vsel %vm86_vm1, %v1125_v62, 0  ;;  %3518 = vmatprep.subr.msk.bf16.mxu0 %vm86_vm1, %v1126_v63 }
  0xd5   :  { %1245 = vmatpush1.bf16.msra.mxu0 %v1143_v0 }
  0xd6   :  { %v1282_v1 = vpop.permute.xlu1 %1281  ;;  %v1280_v3 = vpop.permute.xlu0 %1279 }
  0xd7   :  { %v1294_v4 = vsel %vm1293_vm8, %v1280_v3, %v1282_v1 }
  0xd8   :  { %3517 = vmatmul.mubr.msk.bf16.vlgmr.msra.gmra.mxu1 %vm82_vm2, %v1105_v56  ;;  %3519 = vmatmul.mubr.msk.bf16.vlgmr.msra.gmra.mxu0 %vm82_vm2, %v1105_v56  ;;  %v1304_v8 = vsel %vm86_vm1, %v1294_v4, 0 }
  0xd9   :  { %1353 = vmatprep.mubr.bf16.mxu1 %v3666_v2  ;;  %1394 = vmatprep.mubr.bf16.mxu0 %v3666_v2 }
  0xda   :  { %v1286_v5 = vpop.permute.xlu1 %1285  ;;  %v1284_v6 = vpop.permute.xlu0 %1283 }
  0xdb   :  { %v1295_v7 = vsel %vm1293_vm8, %v1282_v1, %v1284_v6  ;;  %v1296_v9 = vsel %vm1293_vm8, %v1284_v6, %v1286_v5 }
  0xdc   :  { %3520 = vmatprep.subr.msk.bf16.mxu1 %vm86_vm1, %v1295_v7  ;;  %v1310_v13 = vsel %vm86_vm1, %v1296_v9, 0 }
  0xdd   :  { %1336 = vmatpush1.bf16.msra.mxu1 %v1304_v8 }
  0xde   :  { %v1278_v10 = vpop.permute.xlu1 %1277  ;;  %v1288_v11 = vpop.permute.xlu0 %1287 }
  0xdf   :  { %v1297_v12 = vsel %vm1293_vm8, %v1286_v5, %v1288_v11 }
  0xe0   :  { %3521 = vmatmul.mubr.msk.bf16.vlgmr.msra.gmra.mxu1 %vm82_vm2, %v1278_v10  ;;  %3522 = vmatprep.subr.msk.bf16.mxu0 %vm86_vm1, %v1297_v12 }
  0xe1   :  { %1377 = vmatpush1.bf16.msra.mxu0 %v1310_v13  ;;  %1435 = vmatprep.mubr.bf16.mxu1 %v3666_v2 }
  0xe2   :  { %v1292_v16 = vpop.permute.xlu1 %1291  ;;  %v1290_v19 = vpop.permute.xlu0 %1289 }
  0xe3   :  { %v1298_v21 = vsel %vm1293_vm8, %v1288_v11, %v1290_v19  ;;  %v1299_v23 = vsel %vm1293_vm8, %v1290_v19, %v1292_v16 }
  0xe4   :  { %v1316_v24 = vsel %vm86_vm1, %v1298_v21, 0  ;;  %3523 = vmatmul.mubr.msk.bf16.vlgmr.msra.gmra.mxu0 %vm82_vm2, %v1278_v10  ;;  %3524 = vmatprep.subr.msk.bf16.mxu1 %vm86_vm1, %v1299_v23 }
  0xe5   :  { %1418 = vmatpush1.bf16.msra.mxu1 %v1316_v24  ;;  %1526 = vmatprep.mubr.bf16.mxu0 %v3666_v2 }
  0xe6   :  { %v1455_v25 = vpop.permute.xlu1 %1454  ;;  %v1453_v26 = vpop.permute.xlu0 %1452 }
  0xe7   :  { %v1467_v27 = vsel %vm1466_vm9, %v1453_v26, %v1455_v25 }
  0xe8   :  { %3525 = vmatmul.mubr.msk.bf16.vlgmr.msra.gmra.mxu1 %vm82_vm2, %v1278_v10  ;;  %v1477_v31 = vsel %vm86_vm1, %v1467_v27, 0 }
  0xe9   :  { %1567 = vmatprep.mubr.bf16.mxu1 %v3666_v2 }
  0xea   :  { %v1459_v28 = vpop.permute.xlu1 %1458  ;;  %v1457_v29 = vpop.permute.xlu0 %1456 }
  0xeb   :  { %v1468_v30 = vsel %vm1466_vm9, %v1455_v25, %v1457_v29  ;;  %v1469_v32 = vsel %vm1466_vm9, %v1457_v29, %v1459_v28 }
  0xec   :  { %3526 = vmatprep.subr.msk.bf16.mxu0 %vm86_vm1, %v1468_v30  ;;  %v1483_v34 = vsel %vm86_vm1, %v1469_v32, 0 }
  0xed   :  { %1509 = vmatpush1.bf16.msra.mxu0 %v1477_v31 }
  0xee   :  { %v1451_v14 = vpop.permute.xlu1 %1450  ;;  %v1461_v15 = vpop.permute.xlu0 %1460 }
  0xef   :  { %v1470_v33 = vsel %vm1466_vm9, %v1459_v28, %v1461_v15 }
  0xf0   :  { %3527 = vmatmul.mubr.msk.bf16.vlgmr.msra.gmra.mxu0 %vm82_vm2, %v1451_v14  ;;  %3528 = vmatprep.subr.msk.bf16.mxu1 %vm86_vm1, %v1470_v33 }
  0xf1   :  { %1550 = vmatpush1.bf16.msra.mxu1 %v1483_v34  ;;  %1608 = vmatprep.mubr.bf16.mxu0 %v3666_v2 }
  0xf2   :  { %v1465_v35 = vpop.permute.xlu1 %1464  ;;  %v1463_v36 = vpop.permute.xlu0 %1462 }
  0xf3   :  { %v1471_v22 = vsel %vm1466_vm9, %v1461_v15, %v1463_v36  ;;  %v1472_v37 = vsel %vm1466_vm9, %v1463_v36, %v1465_v35 }
  0xf4   :  { %v1489_v17 = vsel %vm86_vm1, %v1471_v22, 0  ;;  %3529 = vmatmul.mubr.msk.bf16.vlgmr.msra.gmra.mxu1 %vm82_vm2, %v1451_v14  ;;  %3530 = vmatprep.subr.msk.bf16.mxu0 %vm86_vm1, %v1472_v37 }
  0xf5   :  { %1591 = vmatpush1.bf16.msra.mxu0 %v1489_v17  ;;  %1877 = vmatprep.mubr.bf16.mxu1 %v3666_v2 }
  0xf8   :  { %3531 = vmatmul.mubr.msk.bf16.vlgmr.msra.gmra.mxu0 %vm82_vm2, %v1451_v14 }
  0xf9   :  { %1918 = vmatprep.mubr.bf16.mxu0 %v3666_v2 }
 0x141   :  { %v139_v18 = vpop.f32.mrf.mxu0 }
 0x143   :  { %v141_v20 = vpop.f32.mrf.mxu0 }
 0x145   :  { %v143_v38 = vpop.f32.mrf.mxu0  ;;  %v180_v39 = vpop.f32.mrf.mxu1 }
 0x147   :  { %v144_v40 = vpop.f32.mrf.mxu0  ;;  %v182_v41 = vpop.f32.mrf.mxu1 }
 0x149   :  { %v184_v42 = vpop.f32.mrf.mxu1  ;;  %v221_v43 = vpop.f32.mrf.mxu0 }
 0x14b   :  { %v185_v44 = vpop.f32.mrf.mxu1  ;;  %v223_v45 = vpop.f32.mrf.mxu0 }
 0x14d   :  { %v225_v46 = vpop.f32.mrf.mxu0 }
 0x14f   :  { %v226_v47 = vpop.f32.mrf.mxu0 }
 0x150   :  { %v304_v48 = vpop.f32.mrf.mxu1 }
 0x151   :  { %v305_v49 = vadd.f32 %v304_v48, %v139_v18 }
 0x152   :  { %v306_v50 = vpop.f32.mrf.mxu1 }
 0x153   :  { %v307_v51 = vadd.f32 %v306_v50, %v141_v20 }
 0x154   :  { %v308_v52 = vpop.f32.mrf.mxu1  ;;  %v345_v53 = vpop.f32.mrf.mxu0 }
 0x155   :  { %v346_v54 = vadd.f32 %v345_v53, %v180_v39 }
 0x156   :  { %v309_v55 = vpop.f32.mrf.mxu1  ;;  %v347_v56 = vpop.f32.mrf.mxu0 }
 0x157   :  { %v348_v57 = vadd.f32 %v347_v56, %v182_v41 }
 0x158   :  { %v386_v58 = vpop.f32.mrf.mxu1  ;;  %v349_v59 = vpop.f32.mrf.mxu0 }
 0x159   :  { %v387_v60 = vadd.f32 %v386_v58, %v221_v43 }
 0x15a   :  { %v388_v61 = vpop.f32.mrf.mxu1  ;;  %v350_v62 = vpop.f32.mrf.mxu0 }
 0x15b   :  { %v389_v63 = vadd.f32 %v388_v61, %v223_v45 }
 0x15c   :  { %v390_v0 = vpop.f32.mrf.mxu1 }
 0x15e   :  { %v391_v1 = vpop.f32.mrf.mxu1 }
 0x15f   :  { %v471_v3 = vpop.f32.mrf.mxu0 }
 0x160   :  { %v4040_v4 = vadd.f32 %v471_v3, %v305_v49  ;;  %v512_v5 = vpop.f32.mrf.mxu1 }
 0x161   :  { %v4042_v6 = vadd.f32 %v512_v5, %v346_v54  ;;  %v473_v7 = vpop.f32.mrf.mxu0 }
 0x162   :  { %v4044_v8 = vadd.f32 %v473_v7, %v307_v51  ;;  %v514_v9 = vpop.f32.mrf.mxu1 }
 0x163   :  { %v4046_v10 = vadd.f32 %v514_v9, %v348_v57  ;;  %v475_v11 = vpop.f32.mrf.mxu0 }
 0x164   :  { %v516_v12 = vpop.f32.mrf.mxu1 }
 0x165   :  { %v476_v13 = vpop.f32.mrf.mxu0  ;;  %v1624_v12 = vlaneseq }
 0x166   :  { %v517_v16 = vpop.f32.mrf.mxu1 }
 0x168   :  { %v553_v19 = vpop.f32.mrf.mxu0 }
 0x169   :  { %v4048_v21 = vadd.f32 %v553_v19, %v387_v60 }
 0x16a   :  { %v555_v23 = vpop.f32.mrf.mxu0 }
 0x16b   :  { %v4050_v24 = vadd.f32 %v555_v23, %v389_v63 }
 0x16c   :  { %v557_v25 = vpop.f32.mrf.mxu0 }
 0x16d   :  { %v4068_v25 = vshrl.u32 %v1624_v12, 7 }
 0x16e   :  { %v558_v26 = vpop.f32.mrf.mxu0 }
 0x16f   :  { %v644_v27 = vpop.f32.mrf.mxu1 }
 0x170   :  { %v4052_v28 = vpop.f32.mrf.mxu0  ;;  %v733_v26 = vadd.f32 %v644_v27, %v4040_v4  ;;  %v1630_v4 = vsub.s32 1, %v4068_v25 }
 0x171   :  { %v646_v29 = vpop.f32.mrf.mxu1 }
 0x172   :  { %v4054_v30 = vpop.f32.mrf.mxu0 }
 0x173   :  { %v648_v31 = vpop.f32.mrf.mxu1 }
 0x174   :  { %v689_v32 = vpop.f32.mrf.mxu0 }
 0x175   :  { %v649_v14 = vpop.f32.mrf.mxu1 }
 0x176   :  { %v690_v15 = vpop.f32.mrf.mxu0  ;;  %v734_v14 = vadd.f32 %v646_v29, %v4044_v8  ;;  %v736_v8 = vadd.f32 %v4054_v30, %v4046_v10 }
 0x178   :  { %v4056_v33 = vpop.f32.mrf.mxu1  ;;  %v814_v34 = vpop.f32.mrf.mxu0 }
 0x179   :  { %v903_v15 = vadd.f32 %v814_v34, %v733_v26 }
 0x17a   :  { %v4058_v35 = vpop.f32.mrf.mxu1  ;;  %v816_v36 = vpop.f32.mrf.mxu0 }
 0x17c   :  { %v730_v22 = vpop.f32.mrf.mxu1  ;;  %v818_v37 = vpop.f32.mrf.mxu0 }
 0x17e   :  { %v731_v17 = vpop.f32.mrf.mxu1  ;;  %v819_v18 = vpop.f32.mrf.mxu0 }
 0x17f   :  { %v1626_v17 = vsub.s32 0, %v4068_v25  ;;  %v735_v18 = vadd.f32 %v4052_v28, %v4042_v6  ;;  %v1634_v28 = vsub.s32 2, %v4068_v25 }
 0x180   :  { %v855_v20 = vpop.f32.mrf.mxu1  ;;  %v4060_v38 = vpop.f32.mrf.mxu0 }
 0x181   :  { %v905_v27 = vadd.f32 %v855_v20, %v735_v18 }
 0x182   :  { %v857_v39 = vpop.f32.mrf.mxu1  ;;  %v4062_v40 = vpop.f32.mrf.mxu0 }
 0x184   :  { %v859_v41 = vpop.f32.mrf.mxu1  ;;  %v900_v42 = vpop.f32.mrf.mxu0 }
 0x185   :  { %v904_v41 = vadd.f32 %v816_v36, %v734_v14  ;;  %v906_v36 = vadd.f32 %v857_v39, %v736_v8 }
 0x186   :  { %v860_v43 = vpop.f32.mrf.mxu1  ;;  %v901_v44 = vpop.f32.mrf.mxu0 }
 0x187   :  { %v30_v43 = vld [vmem:[%s4567_s3] sm:$0x3f] }
 0x188   :  { %v1009_v45 = vpop.f32.mrf.mxu1  ;;  %v1050_v46 = vpop.f32.mrf.mxu0  ;;  %v4083_v6 = vrot.slane %v30_v43, %v1626_v17  ;;  %v4089_v20 = vrot.slane %v30_v43, %v1630_v4 }
 0x189   :  { %v1098_v42 = vadd.f32 %v1009_v45, %v903_v15  ;;  %v1100_v45 = vadd.f32 %v1050_v46, %v905_v27 }
 0x18a   :  { %v1011_v47 = vpop.f32.mrf.mxu1  ;;  %v1052_v48 = vpop.f32.mrf.mxu0 }
 0x18b   :  { %v1099_v29 = vadd.f32 %v1011_v47, %v904_v41  ;;  %v1638_v47 = vsub.s32 3, %v4068_v25 }
 0x18c   :  { %v1013_v49 = vpop.f32.mrf.mxu1  ;;  %v1054_v50 = vpop.f32.mrf.mxu0 }
 0x18d   :  { %v737_v49 = vadd.f32 %v4056_v33, %v4048_v21  ;;  %v1101_v21 = vadd.f32 %v1052_v48, %v906_v36 }
 0x18e   :  { %v1014_v51 = vpop.f32.mrf.mxu1  ;;  %v1055_v52 = vpop.f32.mrf.mxu0 }
 0x18f   :  { %v907_v10 = vadd.f32 %v4060_v38, %v737_v49  ;;  %v4098_v38 = vrot.slane %v30_v43, %v1634_v28 }
 0x190   :  { %v1091_v53 = vpop.f32.mrf.mxu1  ;;  %v1182_v54 = vpop.f32.mrf.mxu0 }
 0x191   :  { %v1271_v34 = vadd.f32 %v1182_v54, %v1098_v42  ;;  %v1102_v46 = vadd.f32 %v1091_v53, %v907_v10 }
 0x192   :  { %v4064_v55 = vpop.f32.mrf.mxu1  ;;  %v1184_v56 = vpop.f32.mrf.mxu0 }
 0x193   :  { %v1272_v51 = vadd.f32 %v1184_v56, %v1099_v29 }
 0x194   :  { %v1095_v57 = vpop.f32.mrf.mxu1  ;;  %v1186_v58 = vpop.f32.mrf.mxu0 }
 0x195   :  { %v738_v57 = vadd.f32 %v4058_v35, %v4050_v24 }
 0x196   :  { %v1096_v59 = vpop.f32.mrf.mxu1  ;;  %v1187_v60 = vpop.f32.mrf.mxu0 }
 0x197   :  { %v908_v39 = vadd.f32 %v4062_v40, %v738_v57  ;;  %v1642_v59 = vsub.s32 4, %v4068_v25 }
 0x198   :  { %v1223_v61 = vpop.f32.mrf.mxu1  ;;  %v1264_v62 = vpop.f32.mrf.mxu0 }
 0x199   :  { %v1273_v33 = vadd.f32 %v1223_v61, %v1100_v45 }
 0x19a   :  { %v1225_v63 = vpop.f32.mrf.mxu1  ;;  %v4066_v0 = vpop.f32.mrf.mxu0 }
 0x19b   :  { %v1274_v60 = vadd.f32 %v1225_v63, %v1101_v21 }
 0x19c   :  { %v1227_v1 = vpop.f32.mrf.mxu1  ;;  %v1268_v3 = vpop.f32.mrf.mxu0 }
 0x19d   :  { %v1103_v1 = vadd.f32 %v4064_v55, %v908_v39  ;;  %v1275_v3 = vadd.f32 %v1264_v62, %v1102_v46  ;;  %v4111_v62 = vrot.slane %v30_v43, %v1642_v59 }
 0x19e   :  { %v1228_v5 = vpop.f32.mrf.mxu1  ;;  %v1269_v7 = vpop.f32.mrf.mxu0 }
 0x19f   :  { %v4101_v5 = vrot.slane %v30_v43, %v1638_v47  ;;  %v1646_v7 = vsub.s32 5, %v4068_v25 }
 0x1a0   :  { %v1355_v9 = vpop.f32.mrf.mxu1 }
 0x1a1   :  { %v1444_v52 = vadd.f32 %v1355_v9, %v1271_v34 }
 0x1a2   :  { %v1357_v11 = vpop.f32.mrf.mxu1 }
 0x1a3   :  { %v1445_v54 = vadd.f32 %v1357_v11, %v1272_v51  ;;  %v1276_v11 = vadd.f32 %v4066_v0, %v1103_v1 }
 0x1a4   :  { %v1359_v13 = vpop.f32.mrf.mxu1  ;;  %v1396_v16 = vpop.f32.mrf.mxu0 }
 0x1a5   :  { %v1446_v24 = vadd.f32 %v1396_v16, %v1273_v33 }
 0x1a6   :  { %v1360_v19 = vpop.f32.mrf.mxu1  ;;  %v1398_v23 = vpop.f32.mrf.mxu0 }
 0x1a7   :  { %v1447_v40 = vadd.f32 %v1398_v23, %v1274_v60 }
 0x1a8   :  { %v1400_v31 = vpop.f32.mrf.mxu0  ;;  %v1437_v32 = vpop.f32.mrf.mxu1 }
 0x1a9   :  { %v1448_v13 = vadd.f32 %v1437_v32, %v1275_v3  ;;  %v4117_v31 = vrot.slane %v30_v43, %v1646_v7 }
 0x1aa   :  { %v1401_v22 = vpop.f32.mrf.mxu0  ;;  %v1439_v37 = vpop.f32.mrf.mxu1 }
 0x1ab   :  { %v1449_v14 = vadd.f32 %v1439_v37, %v1276_v11  ;;  %v33_v11 = vld [vmem:[%s4569_s5] sm:$0xff] }
 0x1ac   :  { %v1441_v44 = vpop.f32.mrf.mxu1 }
 0x1ae   :  { %v1442_v50 = vpop.f32.mrf.mxu1 }
 0x1b0   :  { %v1528_v30 = vpop.f32.mrf.mxu0 }
 0x1b1   :  { %v4092_v58 = vadd.f32 %v1528_v30, %v1444_v52 }
 0x1b2   :  { %v1530_v56 = vpop.f32.mrf.mxu0 }
 0x1b3   :  { %v4096_v35 = vadd.f32 %v1530_v56, %v1445_v54  ;;  %v1654_v53 = vmul.f32 %v4083_v6, %v4092_v58 }
 0x1b4   :  { %v1532_v48 = vpop.f32.mrf.mxu0  ;;  %v1569_v61 = vpop.f32.mrf.mxu1 }
 0x1b5   :  { %v1655_v63 = vmul.f32 %v4089_v20, %v4096_v35  ;;  %v4108_v9 = vadd.f32 %v1569_v61, %v1446_v24 }
 0x1b6   :  { %v1533_v12 = vpop.f32.mrf.mxu0  ;;  %v1571_v55 = vpop.f32.mrf.mxu1 }
 0x1b7   :  { %v1660_v16 = vadd.f32 %v1655_v63, %v1654_v53  ;;  %v1656_v19 = vmul.f32 %v4098_v38, %v4108_v9  ;;  %v4115_v23 = vadd.f32 %v1571_v55, %v1447_v40  ;;  %v32_v40 = vld [vmem:[%s4568_s4] sm:$0xff] }
 0x1b8   :  { %v1573_v25 = vpop.f32.mrf.mxu1  ;;  %v1610_v26 = vpop.f32.mrf.mxu0 }
 0x1b9   :  { %v1661_v15 = vadd.f32 %v1660_v16, %v1656_v19  ;;  %v1657_v0 = vmul.f32 %v4101_v5, %v4115_v23  ;;  %v4121_v22 = vadd.f32 %v1610_v26, %v1448_v13  ;;  %v4146_v13 = vld [vmem:[%s4570_s2] sm:$0xf] }
 0x1ba   :  { %v1574_v17 = vpop.f32.mrf.mxu1  ;;  %v1612_v18 = vpop.f32.mrf.mxu0  ;;  %v4150_v16 = vcombine.low %v4146_v13, %v4146_v13 }
 0x1bb   :  { %v1658_v32 = vmul.f32 %v4111_v62, %v4121_v22  ;;  %v1622_v41 = vadd.f32 %v1612_v18, %v1449_v14  ;;  %v1662_v42 = vadd.f32 %v1661_v15, %v1657_v0 }
 0x1bc   :  { %v1614_v44 = vpop.f32.mrf.mxu0 }
 0x1bd   :  { %v1659_v4 = vmul.f32 %v4117_v31, %v1622_v41  ;;  %v1663_v8 = vadd.f32 %v1662_v42, %v1658_v32 }
 0x1be   :  { %v1615_v43 = vpop.f32.mrf.mxu0 }
 0x1bf   :  { %v1664_v27 = vadd.f32 %v1663_v8, %v1659_v4 }
 0x1c1   :  { %1665 = vadd.xlane.f32.xlu0 %v1664_v27 }
 0x24a   :  { %v1666_v37 = vpop.xlane.xlu0 %1665 }
 0x24b   :  { %v1667_v29 = vmul.f32 0.001953125, %v1666_v37 }
 0x24d   :  { %v1668_v34 = vsub.f32 %v4092_v58, %v1667_v29  ;;  %v1669_v49 = vsub.f32 %v4096_v35, %v1667_v29  ;;  %v1670_v50 = vsub.f32 %v4108_v9, %v1667_v29  ;;  %v1671_v28 = vsub.f32 %v4115_v23, %v1667_v29 }
 0x24e   :  { %v1672_v36 = vsub.f32 %v4121_v22, %v1667_v29  ;;  %v1673_v57 = vsub.f32 %v1622_v41, %v1667_v29 }
 0x24f   :  { %v1674_v45 = vmul.f32 %v1668_v34, %v4083_v6  ;;  %v1675_v51 = vmul.f32 %v1669_v49, %v4089_v20  ;;  %v1676_v52 = vmul.f32 %v1670_v50, %v4098_v38  ;;  %v1677_v10 = vmul.f32 %v1671_v28, %v4101_v5 }
 0x250   :  { %v1678_v21 = vmul.f32 %v1672_v36, %v4111_v62  ;;  %v1679_v39 = vmul.f32 %v1673_v57, %v4117_v31 }
 0x251   :  { %v1680_v30 = vmul.f32 %v1674_v45, %v1674_v45  ;;  %v1681_v47 = vmul.f32 %v1675_v51, %v1675_v51  ;;  %v1682_v33 = vmul.f32 %v1676_v52, %v1676_v52  ;;  %v1683_v46 = vmul.f32 %v1677_v10, %v1677_v10 }
 0x252   :  { %v1684_v59 = vmul.f32 %v1678_v21, %v1678_v21  ;;  %v1685_v24 = vmul.f32 %v1679_v39, %v1679_v39 }
 0x253   :  { %v1686_v54 = vadd.f32 %v1681_v47, %v1680_v30 }
 0x255   :  { %v1687_v56 = vadd.f32 %v1686_v54, %v1682_v33 }
 0x257   :  { %v1688_v60 = vadd.f32 %v1687_v56, %v1683_v46 }
 0x259   :  { %v1689_v1 = vadd.f32 %v1688_v60, %v1684_v59 }
 0x25b   :  { %v1690_v3 = vadd.f32 %v1689_v1, %v1685_v24 }
 0x25d   :  { %1691 = vadd.xlane.f32.xlu1 %v1690_v3 }
 0x2e6   :  { %v1692_v48 = vpop.xlane.xlu1 %1691 }
 0x2e7   :  { %v1693_v61 = vmul.f32 0.001953125, %v1692_v48 }
 0x2e9   :  { %v1694_v7 = vadd.f32 1e-05, %v1693_v61 }
 0x2eb   :  { %3656 = vrsqrt.f32 %v1694_v7 }
 0x2f8   :  { %v3657_v53 = vpop.eup %3656 }
 0x2f9   :  { %v1696_v63 = vmul.f32 %v3657_v53, %v32_v40  ;;  %v3655_v40 = vld [vmem:[#allocation2 + $0x1c] ss:$0 sps:$4 sm:$0xff]  }
 0x2fb   :  { %1701 = vperm.xlu0 %3630, %v1696_v63   ;;  %v1697_v12 = vmul.f32 %v1696_v63, %v1667_v29 }
 0x2fd   :  { %v1698_v55 = vsub.f32 %v33_v11, %v1697_v12 }
 0x2ff   :  { %1712 = vperm.xlu1 %3631, %v1698_v55   ;;  %2132 = vrot.lane.b32.xlu0 %v4150_v16, %s3671_s18 }
 0x303   :  { %1784 = vrot.lane.b32.xlu1 %v4150_v16, %s3668_s14  ;;  %2304 = vrot.lane.b32.xlu0 %v4150_v16, %s3673_s20 }
 0x307   :  { %2479 = vrot.lane.b32.xlu1 %v4150_v16, %s3674_s23 }
 0x30b   :  { %2650 = vrot.lane.b32.xlu1 %v4150_v16, %s3676_s29 }
 0x376   :  { %v1702_v19 = vpop.permute.xlu0 %1701 }
 0x377   :  { %v1704_v25 = vmul.f32 %v1702_v19, %v4092_v58  ;;  %v1705_v26 = vmul.f32 %v1702_v19, %v4096_v35  ;;  %v1706_v14 = vmul.f32 %v1702_v19, %v4108_v9  ;;  %v1707_v15 = vmul.f32 %v1702_v19, %v4115_v23 }
 0x378   :  { %v1708_v0 = vmul.f32 %v1702_v19, %v4121_v22  ;;  %v1709_v17 = vmul.f32 %v1702_v19, %v1622_v41 }
 0x37a   :  { %v1713_v18 = vpop.permute.xlu1 %1712  ;;  %v4270_v55 = vpop.permute.xlu0 %2132 }
 0x37b   :  { %v1715_v32 = vadd.f32 %v1713_v18, %v1704_v25  ;;  %v1716_v42 = vadd.f32 %v1713_v18, %v1705_v26  ;;  %v1717_v44 = vadd.f32 %v1713_v18, %v1706_v14  ;;  %v1718_v4 = vadd.f32 %v1713_v18, %v1707_v15 }
 0x37c   :  { %v1719_v8 = vadd.f32 %v1713_v18, %v1708_v0  ;;  %v1720_v43 = vadd.f32 %v1713_v18, %v1709_v17 }
 0x37d   :  { %vm1721_vm10 = vcmp.gt.f32.partialorder %v1715_v32, 0.0  ;;  %vm1722_vm11 = vcmp.gt.f32.partialorder %v1716_v42, 0.0  ;;  %vm1723_vm12 = vcmp.gt.f32.partialorder %v1717_v44, 0.0  ;;  %vm1724_vm13 = vcmp.gt.f32.partialorder %v1718_v4, 0.0 }
 0x37e   :  { %vm1725_vm14 = vcmp.gt.f32.partialorder %v1719_v8, 0.0  ;;  %vm1726_vm15 = vcmp.gt.f32.partialorder %v1720_v43, 0.0  ;;  %v1727_v58 = vmul.f32 0.01, %v1715_v32  ;;  %v1728_v35 = vmul.f32 0.01, %v1716_v42  ;;  %v1785_v11 = vpop.permute.xlu1 %1784  ;;  %v4280_v25 = vpop.permute.xlu0 %2304 }
 0x37f   :  { %v1729_v9 = vmul.f32 0.01, %v1717_v44  ;;  %v1730_v23 = vmul.f32 0.01, %v1718_v4  ;;  %v1731_v27 = vmul.f32 0.01, %v1719_v8 }
 0x380   :  { %v1732_v22 = vmul.f32 0.01, %v1720_v43  ;;  %v1733_v41 = vsel %vm1721_vm10, %v1715_v32, %v1727_v58  ;;  %v1734_v37 = vsel %vm1722_vm11, %v1716_v42, %v1728_v35 }
 0x381   :  { %v1735_v29 = vsel %vm1723_vm12, %v1717_v44, %v1729_v9  ;;  %v1736_v34 = vsel %vm1724_vm13, %v1718_v4, %v1730_v23  ;;  %v1737_v49 = vsel %vm1725_vm14, %v1719_v8, %v1731_v27  ;;  %v1739_v50 = vmul.f32 %v1733_v41, %v4083_v6 }
 0x382   :  { %v1738_v28 = vsel %vm1726_vm15, %v1720_v43, %v1732_v22  ;;  %v4169_v36 = vmul.f32 %v1734_v37, %v4089_v20  ;;  %v1741_v45 = vmul.f32 %v1735_v29, %v4098_v38  ;;  %v4173_v51 = vmul.f32 %v1736_v34, %v4101_v5  ;;  %v4268_v12 = vpop.permute.xlu1 %2479 }
 0x383   :  { %v1743_v52 = vmul.f32 %v1737_v49, %v4111_v62  ;;  %v1744_v57 = vmul.f32 %v1738_v28, %v4117_v31  ;;  %v4201_v3 = vpack.c.bf16 %v1739_v50, %v1739_v50 }
 0x384   :  { %v3610_v10 = vpack.c.bf16 %v4169_v36, %v1739_v50  ;;  %v3611_v30 = vpack.c.bf16 %v4173_v51, %v1741_v45  ;;  %v4206_v48 = vpack.c.bf16 %v1741_v45, %v1741_v45  ;;  %v4239_v53 = vpack.c.bf16 %v4169_v36, %v4169_v36 }
 0x385   :  { %v3612_v47 = vpack.c.bf16 %v1744_v57, %v1743_v52  ;;  %v4211_v61 = vpack.c.bf16 %v1743_v52, %v1743_v52  ;;  %v4216_v7 = vpack.c.bf16 %v1744_v57, %v1744_v57  ;;  %v4247_v63 = vpack.c.bf16 %v4173_v51, %v4173_v51 }
 0x386   :  { %1771 = vst [vmem:[#allocation2 + $0x4] sm:$0xff] %v3610_v10  ;;  %1772 = vst [vmem:[#allocation2 + $0xc] sm:$0xff] %v3611_v30  ;;  %v4278_v19 = vpop.permute.xlu1 %2650 }
 0x387   :  { %1773 = vst [vmem:[#allocation2 + $0x14] sm:$0xff] %v3612_v47 }
 0x38d   :  { %v1777_v21 = vld [vmem:[#allocation2] sm:$0xff]  ;;  %v1778_v56 = vld [vmem:[#allocation2 + $0x8] sm:$0xff] }
 0x38e   :  { %v1779_v33 = vld [vmem:[#allocation2 + $0x10] sm:$0xff]  ;;  %v3536_v54 = vcombine.low %v1777_v21, %v1777_v21  ;;  %v3537_v46 = vcombine.high %v1777_v21, %v1777_v21  ;;  %v3538_v59 = vcombine.low %v1778_v56, %v1778_v56  ;;  %v3539_v60 = vcombine.high %v1778_v56, %v1778_v56  ;;  %v3654_v1 = vld [vmem:[#allocation2 + $0x18] ss:$0 sps:$4 sm:$0xff]  }
 0x38f   :  { %v3541_v39 = vcombine.high %v1779_v33, %v1779_v33  ;;  %v3540_v24 = vcombine.low %v1779_v33, %v1779_v33 }
 0x390   :  { %1804 = vrot.lane.b32.xlu1 %v3536_v54, %s3667_s9 }
 0x391   :  { %1814 = vrot.lane.b32.xlu0 %v3541_v39, %s3667_s9 }
 0x394   :  { %1806 = vrot.lane.b32.xlu1 %v3537_v46, %s3667_s9 }
 0x395   :  { %1968 = vrot.lane.b32.xlu0 %v3536_v54, %s3669_s16 }
 0x398   :  { %1808 = vrot.lane.b32.xlu1 %v3538_v59, %s3667_s9 }
 0x399   :  { %1972 = vrot.lane.b32.xlu0 %v3538_v59, %s3669_s16 }
 0x39c   :  { %1810 = vrot.lane.b32.xlu1 %v3539_v60, %s3667_s9 }
 0x39d   :  { %1976 = vrot.lane.b32.xlu0 %v3540_v24, %s3669_s16 }
 0x3a0   :  { %1812 = vrot.lane.b32.xlu1 %v3540_v24, %s3667_s9 }
 0x3a1   :  { %1980 = vrot.lane.b32.xlu0 %v3654_v1, %s3669_s16 }
 0x3a4   :  { %1816 = vrot.lane.b32.xlu1 %v3654_v1, %s3667_s9 }
 0x3a5   :  { %2136 = vrot.lane.b32.xlu0 %v3537_v46, %s3670_s17 }
 0x3a8   :  { %1970 = vrot.lane.b32.xlu1 %v3537_v46, %s3669_s16 }
 0x3a9   :  { %2140 = vrot.lane.b32.xlu0 %v3539_v60, %s3670_s17 }
 0x3ac   :  { %1974 = vrot.lane.b32.xlu1 %v3539_v60, %s3669_s16 }
 0x3ad   :  { %2146 = vrot.lane.b32.xlu0 %v3654_v1, %s3670_s17 }
 0x3b0   :  { %1978 = vrot.lane.b32.xlu1 %v3541_v39, %s3669_s16 }
 0x3b1   :  { %2308 = vrot.lane.b32.xlu0 %v3537_v46, %s3672_s19 }
 0x3b4   :  { %2134 = vrot.lane.b32.xlu1 %v3536_v54, %s3670_s17 }
 0x3b5   :  { %2312 = vrot.lane.b32.xlu0 %v3539_v60, %s3672_s19 }
 0x3b8   :  { %2138 = vrot.lane.b32.xlu1 %v3538_v59, %s3670_s17 }
 0x3b9   :  { %2318 = vrot.lane.b32.xlu0 %v3654_v1, %s3672_s19 }
 0x3bc   :  { %2142 = vrot.lane.b32.xlu1 %v3540_v24, %s3670_s17 }
 0x3bd   :  { %2670 = vrot.lane.b32.xlu0 %v4201_v3, %s3675_s26 }
 0x3c0   :  { %2144 = vrot.lane.b32.xlu1 %v3541_v39, %s3670_s17 }
 0x3c1   :  { %2674 = vrot.lane.b32.xlu0 %v4206_v48, %s3675_s26 }
 0x3c4   :  { %2306 = vrot.lane.b32.xlu1 %v3536_v54, %s3672_s19 }
 0x3c5   :  { %2678 = vrot.lane.b32.xlu0 %v4211_v61, %s3675_s26 }
 0x3c8   :  { %2310 = vrot.lane.b32.xlu1 %v3538_v59, %s3672_s19 }
 0x3c9   :  { %2680 = vrot.lane.b32.xlu0 %v4216_v7, %s3675_s26 }
 0x3cc   :  { %2314 = vrot.lane.b32.xlu1 %v3540_v24, %s3672_s19 }
 0x3cd   :  { %2842 = vrot.lane.b32.xlu0 %v4201_v3, %s3677_s11 }
 0x3d0   :  { %2316 = vrot.lane.b32.xlu1 %v3541_v39, %s3672_s19 }
 0x3d1   :  { %2846 = vrot.lane.b32.xlu0 %v4206_v48, %s3677_s11 }
 0x3d4   :  { %2682 = vrot.lane.b32.xlu1 %v3655_v40, %s3675_s26 }
 0x3d5   :  { %2850 = vrot.lane.b32.xlu0 %v4211_v61, %s3677_s11 }
 0x3d8   :  { %2840 = vrot.lane.b32.xlu1 %v4150_v16, %s3678_s0 }
 0x3d9   :  { %2852 = vrot.lane.b32.xlu0 %v4216_v7, %s3677_s11 }
 0x3dc   :  { %2854 = vrot.lane.b32.xlu1 %v3655_v40, %s3677_s11 }
 0x3dd   :  { %3014 = vrot.lane.b32.xlu0 %v4201_v3, %s3679_s12 }
 0x3e0   :  { %2672 = vrot.lane.b32.xlu1 %v4239_v53, %s3675_s26 }
 0x3e1   :  { %3018 = vrot.lane.b32.xlu0 %v4206_v48, %s3679_s12 }
 0x3e4   :  { %2676 = vrot.lane.b32.xlu1 %v4247_v63, %s3675_s26 }
 0x3e5   :  { %3022 = vrot.lane.b32.xlu0 %v4211_v61, %s3679_s12 }
 0x3e8   :  { %3012 = vrot.lane.b32.xlu1 %v4150_v16, %s3680_s13 }
 0x3e9   :  { %3024 = vrot.lane.b32.xlu0 %v4216_v7, %s3679_s12 }
 0x3ec   :  { %2844 = vrot.lane.b32.xlu1 %v4239_v53, %s3677_s11 }
 0x3ed   :  { %3186 = vrot.lane.b32.xlu0 %v4201_v3, %s3681_s1 }
 0x3f0   :  { %2848 = vrot.lane.b32.xlu1 %v4247_v63, %s3677_s11 }
 0x3f1   :  { %3190 = vrot.lane.b32.xlu0 %v4206_v48, %s3681_s1 }
 0x3f4   :  { %3026 = vrot.lane.b32.xlu1 %v3655_v40, %s3679_s12 }
 0x3f5   :  { %3194 = vrot.lane.b32.xlu0 %v4211_v61, %s3681_s1 }
 0x3f8   :  { %3016 = vrot.lane.b32.xlu1 %v4239_v53, %s3679_s12 }
 0x3f9   :  { %3196 = vrot.lane.b32.xlu0 %v4216_v7, %s3681_s1 }
 0x3fc   :  { %3020 = vrot.lane.b32.xlu1 %v4247_v63, %s3679_s12 }
 0x400   :  { %3184 = vrot.lane.b32.xlu1 %v4150_v16, %s3682_s15 }
 0x402   :  { %v1805_v26 = vpop.permute.xlu1 %1804 }
 0x403   :  { %v1815_v14 = vpop.permute.xlu0 %1814 }
 0x404   :  { %3188 = vrot.lane.b32.xlu1 %v4239_v53, %s3681_s1 }
 0x406   :  { %v1807_v15 = vpop.permute.xlu1 %1806 }
 0x407   :  { %v1969_v0 = vpop.permute.xlu0 %1968  ;;  %v1818_v17 = vsel %vm75_vm0, %v1805_v26, %v1807_v15 }
 0x408   :  { %3192 = vrot.lane.b32.xlu1 %v4247_v63, %s3681_s1  ;;  %v1828_v44 = vsel %vm86_vm1, %v1818_v17, 0 }
 0x40a   :  { %v1809_v18 = vpop.permute.xlu1 %1808 }
 0x40b   :  { %v1973_v32 = vpop.permute.xlu0 %1972  ;;  %v1819_v42 = vsel %vm75_vm0, %v1807_v15, %v1809_v18 }
 0x40c   :  { %3198 = vrot.lane.b32.xlu1 %v3655_v40, %s3681_s1  ;;  %3543 = vmatprep.subr.msk.bf16.mxu1 %vm86_vm1, %v1819_v42 }
 0x40d   :  { %1860 = vmatpush1.bf16.msra.mxu1 %v1828_v44 }
 0x40e   :  { %v1811_v16 = vpop.permute.xlu1 %1810 }
 0x40f   :  { %v1977_v4 = vpop.permute.xlu0 %1976  ;;  %v1820_v8 = vsel %vm75_vm0, %v1809_v18, %v1811_v16 }
 0x410   :  { %3544 = vmatmul.mubr.msk.bf16.vlgmr.msra.gmra.mxu1 %vm82_vm2, %v1785_v11  ;;  %v1834_v9 = vsel %vm86_vm1, %v1820_v8, 0 }
 0x411   :  { %1959 = vmatprep.mubr.bf16.mxu1 %v3666_v2 }
 0x412   :  { %v1813_v43 = vpop.permute.xlu1 %1812 }
 0x413   :  { %v1981_v58 = vpop.permute.xlu0 %1980  ;;  %v1821_v35 = vsel %vm75_vm0, %v1811_v16, %v1813_v43  ;;  %v1822_v23 = vsel %vm75_vm0, %v1813_v43, %v1815_v14 }
 0x414   :  { %3545 = vmatprep.subr.msk.bf16.mxu0 %vm86_vm1, %v1821_v35  ;;  %v1840_v37 = vsel %vm86_vm1, %v1822_v23, 0 }
 0x415   :  { %1901 = vmatpush1.bf16.msra.mxu0 %v1834_v9 }
 0x416   :  { %v1817_v27 = vpop.permute.xlu1 %1816 }
 0x417   :  { %v2137_v22 = vpop.permute.xlu0 %2136  ;;  %v1823_v41 = vsel %vm75_vm0, %v1815_v14, %v1817_v27 }
 0x418   :  { %3546 = vmatmul.mubr.msk.bf16.vlgmr.msra.gmra.mxu0 %vm82_vm2, %v1785_v11  ;;  %3547 = vmatprep.subr.msk.bf16.mxu1 %vm86_vm1, %v1823_v41 }
 0x419   :  { %1942 = vmatpush1.bf16.msra.mxu1 %v1840_v37  ;;  %2041 = vmatprep.mubr.bf16.mxu0 %v3666_v2 }
 0x41a   :  { %v1971_v29 = vpop.permute.xlu1 %1970 }
 0x41b   :  { %v2141_v34 = vpop.permute.xlu0 %2140  ;;  %v1982_v49 = vsel %vm242_vm3, %v1969_v0, %v1971_v29  ;;  %v1983_v50 = vsel %vm242_vm3, %v1971_v29, %v1973_v32 }
 0x41c   :  { %v1992_v28 = vsel %vm86_vm1, %v1982_v49, 0  ;;  %3548 = vmatmul.mubr.msk.bf16.vlgmr.msra.gmra.mxu1 %vm82_vm2, %v1785_v11  ;;  %3549 = vmatprep.subr.msk.bf16.mxu0 %vm86_vm1, %v1983_v50  ;;  %v2506_v50 = vsel %vm86_vm1, %v4206_v48, 0 }
 0x41d   :  { %2024 = vmatpush1.bf16.msra.mxu0 %v1992_v28  ;;  %2082 = vmatprep.mubr.bf16.mxu1 %v3666_v2 }
 0x41e   :  { %v1975_v36 = vpop.permute.xlu1 %1974 }
 0x41f   :  { %v2147_v45 = vpop.permute.xlu0 %2146  ;;  %v1984_v51 = vsel %vm242_vm3, %v1973_v32, %v1975_v36  ;;  %v1985_v52 = vsel %vm242_vm3, %v1975_v36, %v1977_v4 }
 0x420   :  { %v1998_v57 = vsel %vm86_vm1, %v1984_v51, 0  ;;  %3550 = vmatmul.mubr.msk.bf16.vlgmr.msra.gmra.mxu0 %vm82_vm2, %v4146_v13  ;;  %3551 = vmatprep.subr.msk.bf16.mxu1 %vm86_vm1, %v1985_v52 }
 0x421   :  { %2065 = vmatpush1.bf16.msra.mxu1 %v1998_v57  ;;  %2123 = vmatprep.mubr.bf16.mxu0 %v3666_v2 }
 0x422   :  { %v1979_v10 = vpop.permute.xlu1 %1978 }
 0x423   :  { %v2309_v30 = vpop.permute.xlu0 %2308  ;;  %v1986_v47 = vsel %vm242_vm3, %v1977_v4, %v1979_v10  ;;  %v1987_v21 = vsel %vm242_vm3, %v1979_v10, %v1981_v58 }
 0x424   :  { %v2004_v33 = vsel %vm86_vm1, %v1986_v47, 0  ;;  %3552 = vmatmul.mubr.msk.bf16.vlgmr.msra.gmra.mxu1 %vm82_vm2, %v4146_v13  ;;  %3553 = vmatprep.subr.msk.bf16.mxu0 %vm86_vm1, %v1987_v21 }
 0x425   :  { %2106 = vmatpush1.bf16.msra.mxu0 %v2004_v33  ;;  %2207 = vmatprep.mubr.bf16.mxu1 %v3666_v2 }
 0x426   :  { %v2135_v54 = vpop.permute.xlu1 %2134 }
 0x427   :  { %v2313_v39 = vpop.permute.xlu0 %2312  ;;  %v2148_v46 = vsel %vm409_vm4, %v2135_v54, %v2137_v22 }
 0x428   :  { %3554 = vmatmul.mubr.msk.bf16.vlgmr.msra.gmra.mxu0 %vm82_vm2, %v4146_v13  ;;  %v2158_v24 = vsel %vm86_vm1, %v2148_v46, 0 }
 0x429   :  { %2248 = vmatprep.mubr.bf16.mxu0 %v3666_v2 }
 0x42a   :  { %v2139_v56 = vpop.permute.xlu1 %2138 }
 0x42b   :  { %v2319_v59 = vpop.permute.xlu0 %2318  ;;  %v2149_v60 = vsel %vm409_vm4, %v2137_v22, %v2139_v56  ;;  %v2150_v1 = vsel %vm409_vm4, %v2139_v56, %v2141_v34 }
 0x42c   :  { %3555 = vmatprep.subr.msk.bf16.mxu1 %vm86_vm1, %v2149_v60  ;;  %v2164_v26 = vsel %vm86_vm1, %v2150_v1, 0 }
 0x42d   :  { %2190 = vmatpush1.bf16.msra.mxu1 %v2158_v24 }
 0x42e   :  { %v2143_v40 = vpop.permute.xlu1 %2142 }
 0x42f   :  { %v4333_v11 = vpop.permute.xlu0 %2670  ;;  %v2151_v13 = vsel %vm409_vm4, %v2141_v34, %v2143_v40  ;;  %v2500_v34 = vsel %vm86_vm1, %v4201_v3, 0 }
 0x430   :  { %3556 = vmatmul.mubr.msk.bf16.vlgmr.msra.gmra.mxu1 %vm82_vm2, %v4270_v55  ;;  %3557 = vmatprep.subr.msk.bf16.mxu0 %vm86_vm1, %v2151_v13 }
 0x431   :  { %2231 = vmatpush1.bf16.msra.mxu0 %v2164_v26  ;;  %2289 = vmatprep.mubr.bf16.mxu1 %v3666_v2 }
 0x432   :  { %v2145_v14 = vpop.permute.xlu1 %2144 }
 0x433   :  { %v4341_v15 = vpop.permute.xlu0 %2674  ;;  %v2152_v0 = vsel %vm409_vm4, %v2143_v40, %v2145_v14  ;;  %v2153_v17 = vsel %vm409_vm4, %v2145_v14, %v2147_v45 }
 0x434   :  { %v2170_v18 = vsel %vm86_vm1, %v2152_v0, 0  ;;  %3558 = vmatmul.mubr.msk.bf16.vlgmr.msra.gmra.mxu0 %vm82_vm2, %v4270_v55  ;;  %3559 = vmatprep.subr.msk.bf16.mxu1 %vm86_vm1, %v2153_v17 }
 0x435   :  { %2272 = vmatpush1.bf16.msra.mxu1 %v2170_v18  ;;  %2379 = vmatprep.mubr.bf16.mxu0 %v3666_v2 }
 0x436   :  { %v2307_v32 = vpop.permute.xlu1 %2306 }
 0x437   :  { %v4350_v42 = vpop.permute.xlu0 %2678  ;;  %v2320_v44 = vsel %vm582_vm5, %v2307_v32, %v2309_v30 }
 0x438   :  { %3560 = vmatmul.mubr.msk.bf16.vlgmr.msra.gmra.mxu1 %vm82_vm2, %v4270_v55  ;;  %v2330_v43 = vsel %vm86_vm1, %v2320_v44, 0 }
 0x439   :  { %2420 = vmatprep.mubr.bf16.mxu1 %v3666_v2 }
 0x43a   :  { %v2311_v16 = vpop.permute.xlu1 %2310 }
 0x43b   :  { %v2681_v4 = vpop.permute.xlu0 %2680  ;;  %v2321_v8 = vsel %vm582_vm5, %v2309_v30, %v2311_v16  ;;  %v2322_v58 = vsel %vm582_vm5, %v2311_v16, %v2313_v39 }
 0x43c   :  { %3561 = vmatprep.subr.msk.bf16.mxu0 %vm86_vm1, %v2321_v8  ;;  %v2336_v23 = vsel %vm86_vm1, %v2322_v58, 0 }
 0x43d   :  { %2362 = vmatpush1.bf16.msra.mxu0 %v2330_v43 }
 0x43e   :  { %v2315_v35 = vpop.permute.xlu1 %2314 }
 0x43f   :  { %v4360_v9 = vpop.permute.xlu0 %2842  ;;  %v2323_v55 = vsel %vm582_vm5, %v2313_v39, %v2315_v35 }
 0x440   :  { %3562 = vmatmul.mubr.msk.bf16.vlgmr.msra.gmra.mxu0 %vm82_vm2, %v4280_v25  ;;  %3563 = vmatprep.subr.msk.bf16.mxu1 %vm86_vm1, %v2323_v55 }
 0x441   :  { %2403 = vmatpush1.bf16.msra.mxu1 %v2336_v23  ;;  %2461 = vmatprep.mubr.bf16.mxu0 %v3666_v2 }
 0x442   :  { %3573 = vmatprep.subr.msk.bf16.mxu1 %vm86_vm1, %v4239_v53  ;;  %v2317_v27 = vpop.permute.xlu1 %2316 }
 0x443   :  { %v4370_v22 = vpop.permute.xlu0 %2846  ;;  %v2324_v41 = vsel %vm582_vm5, %v2315_v35, %v2317_v27  ;;  %v2325_v37 = vsel %vm582_vm5, %v2317_v27, %v2319_v59 }
 0x444   :  { %v2342_v29 = vsel %vm86_vm1, %v2324_v41, 0  ;;  %3564 = vmatmul.mubr.msk.bf16.vlgmr.msra.gmra.mxu1 %vm82_vm2, %v4280_v25  ;;  %3565 = vmatprep.subr.msk.bf16.mxu0 %vm86_vm1, %v2325_v37 }
 0x445   :  { %2444 = vmatpush1.bf16.msra.mxu0 %v2342_v29  ;;  %2532 = vmatpush1.bf16.msra.mxu1 %v2500_v34 }
 0x446   :  { %3575 = vmatprep.subr.msk.bf16.mxu0 %vm86_vm1, %v4247_v63  ;;  %3577 = vmatprep.subr.msk.bf16.mxu1 %vm86_vm1, %v4216_v7  ;;  %v2683_v53 = vpop.permute.xlu1 %2682  ;;  %v2512_v7 = vsel %vm86_vm1, %v4211_v61, 0  ;;  %v2688_v61 = vsel %vm947_vm6, %v4350_v42, %v2681_v4 }
 0x447   :  { %v2851_v49 = vpop.permute.xlu0 %2850  ;;  %2549 = vmatprep.mubr.bf16.mxu1 %v3666_v2  ;;  %v2689_v52 = vsel %vm947_vm6, %v2681_v4, %v2683_v53  ;;  %v2706_v47 = vsel %vm86_vm1, %v2688_v61, 0 }
 0x448   :  { %3566 = vmatmul.mubr.msk.bf16.vlgmr.msra.gmra.mxu0 %vm82_vm2, %v4280_v25 }
 0x449   :  { %2573 = vmatpush1.bf16.msra.mxu0 %v2506_v50  ;;  %2590 = vmatprep.mubr.bf16.mxu0 %v3666_v2 }
 0x44a   :  { %v4390_v3 = vpop.permute.xlu1 %2840 }
 0x44b   :  { %v2853_v28 = vpop.permute.xlu0 %2852 }
 0x44c   :  { %3574 = vmatmul.mubr.msk.bf16.vlgmr.msra.gmra.mxu1 %vm82_vm2, %v4268_v12  ;;  %v2860_v60 = vsel %vm1120_vm7, %v2851_v49, %v2853_v28 }
 0x44d   :  { %2614 = vmatpush1.bf16.msra.mxu1 %v2512_v7  ;;  %2631 = vmatprep.mubr.bf16.mxu1 %v3666_v2 }
 0x44e   :  { %v2855_v63 = vpop.permute.xlu1 %2854 }
 0x44f   :  { %v3015_v25 = vpop.permute.xlu0 %3014  ;;  %v2861_v24 = vsel %vm1120_vm7, %v2853_v28, %v2855_v63 }
 0x450   :  { %3576 = vmatmul.mubr.msk.bf16.vlgmr.msra.gmra.mxu0 %vm82_vm2, %v4268_v12 }
 0x451   :  { %2743 = vmatprep.mubr.bf16.mxu0 %v3666_v2 }
 0x452   :  { %v2673_v48 = vpop.permute.xlu1 %2672 }
 0x453   :  { %v2684_v36 = vsel %vm947_vm6, %v4333_v11, %v2673_v48  ;;  %v2685_v45 = vsel %vm947_vm6, %v2673_v48, %v4341_v15  ;;  %v3019_v57 = vpop.permute.xlu0 %3018 }
 0x454   :  { %v2694_v51 = vsel %vm86_vm1, %v2684_v36, 0  ;;  %3578 = vmatmul.mubr.msk.bf16.vlgmr.msra.gmra.mxu1 %vm82_vm2, %v4268_v12  ;;  %3586 = vmatprep.subr.msk.bf16.mxu0 %vm86_vm1, %v2685_v45 }
 0x455   :  { %2726 = vmatpush1.bf16.msra.mxu0 %v2694_v51  ;;  %2784 = vmatprep.mubr.bf16.mxu1 %v3666_v2 }
 0x456   :  { %3590 = vmatprep.subr.msk.bf16.mxu0 %vm86_vm1, %v2689_v52  ;;  %v2677_v10 = vpop.permute.xlu1 %2676 }
 0x457   :  { %v2686_v30 = vsel %vm947_vm6, %v4341_v15, %v2677_v10  ;;  %v2687_v12 = vsel %vm947_vm6, %v2677_v10, %v4350_v42  ;;  %v3023_v54 = vpop.permute.xlu0 %3022 }
 0x458   :  { %v2700_v21 = vsel %vm86_vm1, %v2686_v30, 0  ;;  %3587 = vmatmul.mubr.msk.bf16.vlgmr.msra.gmra.mxu0 %vm82_vm2, %v4278_v19  ;;  %3588 = vmatprep.subr.msk.bf16.mxu1 %vm86_vm1, %v2687_v12 }
 0x459   :  { %2767 = vmatpush1.bf16.msra.mxu1 %v2700_v21  ;;  %2808 = vmatpush1.bf16.msra.mxu0 %v2706_v47 }
 0x45a   :  { %v3013_v33 = vpop.permute.xlu1 %3012  ;;  %2825 = vmatprep.mubr.bf16.mxu0 %v3666_v2 }
 0x45b   :  { %v3025_v1 = vpop.permute.xlu0 %3024 }
 0x45c   :  { %3589 = vmatmul.mubr.msk.bf16.vlgmr.msra.gmra.mxu1 %vm82_vm2, %v4278_v19  ;;  %v3032_v42 = vsel %vm1293_vm8, %v3023_v54, %v3025_v1 }
 0x45d   :  { %2915 = vmatprep.mubr.bf16.mxu1 %v3666_v2  ;;  %v3050_v58 = vsel %vm86_vm1, %v3032_v42, 0 }
 0x45e   :  { %v2845_v39 = vpop.permute.xlu1 %2844 }
 0x45f   :  { %v2856_v46 = vsel %vm1120_vm7, %v4360_v9, %v2845_v39  ;;  %v2857_v56 = vsel %vm1120_vm7, %v2845_v39, %v4370_v22  ;;  %v3187_v15 = vpop.permute.xlu0 %3186 }
 0x460   :  { %v2866_v59 = vsel %vm86_vm1, %v2856_v46, 0  ;;  %3591 = vmatmul.mubr.msk.bf16.vlgmr.msra.gmra.mxu0 %vm82_vm2, %v4278_v19  ;;  %3592 = vmatprep.subr.msk.bf16.mxu1 %vm86_vm1, %v2857_v56  ;;  %v2878_v19 = vsel %vm86_vm1, %v2860_v60, 0 }
 0x461   :  { %2898 = vmatpush1.bf16.msra.mxu1 %v2866_v59  ;;  %2956 = vmatprep.mubr.bf16.mxu0 %v3666_v2 }
 0x462   :  { %3596 = vmatprep.subr.msk.bf16.mxu1 %vm86_vm1, %v2861_v24  ;;  %v2849_v40 = vpop.permute.xlu1 %2848 }
 0x463   :  { %v2858_v11 = vsel %vm1120_vm7, %v4370_v22, %v2849_v40  ;;  %v2859_v13 = vsel %vm1120_vm7, %v2849_v40, %v2851_v49  ;;  %v3191_v16 = vpop.permute.xlu0 %3190 }
 0x464   :  { %v2872_v26 = vsel %vm86_vm1, %v2858_v11, 0  ;;  %3593 = vmatmul.mubr.msk.bf16.vlgmr.msra.gmra.mxu1 %vm82_vm2, %v4390_v3  ;;  %3594 = vmatprep.subr.msk.bf16.mxu0 %vm86_vm1, %v2859_v13 }
 0x465   :  { %2939 = vmatpush1.bf16.msra.mxu0 %v2872_v26  ;;  %2980 = vmatpush1.bf16.msra.mxu1 %v2878_v19 }
 0x466   :  { %v3027_v14 = vpop.permute.xlu1 %3026  ;;  %2997 = vmatprep.mubr.bf16.mxu1 %v3666_v2 }
 0x467   :  { %v3033_v44 = vsel %vm1293_vm8, %v3025_v1, %v3027_v14  ;;  %v3195_v55 = vpop.permute.xlu0 %3194 }
 0x468   :  { %3595 = vmatmul.mubr.msk.bf16.vlgmr.msra.gmra.mxu0 %vm82_vm2, %v4390_v3 }
 0x469   :  { %3087 = vmatprep.mubr.bf16.mxu0 %v3666_v2 }
 0x46a   :  { %v3017_v0 = vpop.permute.xlu1 %3016 }
 0x46b   :  { %v3028_v17 = vsel %vm1293_vm8, %v3015_v25, %v3017_v0  ;;  %v3029_v18 = vsel %vm1293_vm8, %v3017_v0, %v3019_v57  ;;  %v3197_v37 = vpop.permute.xlu0 %3196 }
 0x46c   :  { %v3038_v32 = vsel %vm86_vm1, %v3028_v17, 0  ;;  %3597 = vmatmul.mubr.msk.bf16.vlgmr.msra.gmra.mxu1 %vm82_vm2, %v4390_v3  ;;  %3598 = vmatprep.subr.msk.bf16.mxu0 %vm86_vm1, %v3029_v18  ;;  %v3204_v50 = vsel %vm1466_vm9, %v3195_v55, %v3197_v37 }
 0x46d   :  { %3070 = vmatpush1.bf16.msra.mxu0 %v3038_v32  ;;  %3128 = vmatprep.mubr.bf16.mxu1 %v3666_v2  ;;  %v3222_v7 = vsel %vm86_vm1, %v3204_v50, 0 }
 0x46e   :  { %3602 = vmatprep.subr.msk.bf16.mxu0 %vm86_vm1, %v3033_v44  ;;  %v3021_v4 = vpop.permute.xlu1 %3020 }
 0x46f   :  { %v3030_v8 = vsel %vm1293_vm8, %v3019_v57, %v3021_v4  ;;  %v3031_v43 = vsel %vm1293_vm8, %v3021_v4, %v3023_v54 }
 0x470   :  { %v3044_v35 = vsel %vm86_vm1, %v3030_v8, 0  ;;  %3599 = vmatmul.mubr.msk.bf16.vlgmr.msra.gmra.mxu0 %vm82_vm2, %v3013_v33  ;;  %3600 = vmatprep.subr.msk.bf16.mxu1 %vm86_vm1, %v3031_v43 }
 0x471   :  { %3111 = vmatpush1.bf16.msra.mxu1 %v3044_v35  ;;  %3152 = vmatpush1.bf16.msra.mxu0 %v3050_v58 }
 0x472   :  { %v3185_v9 = vpop.permute.xlu1 %3184  ;;  %3169 = vmatprep.mubr.bf16.mxu0 %v3666_v2 }
 0x474   :  { %3601 = vmatmul.mubr.msk.bf16.vlgmr.msra.gmra.mxu1 %vm82_vm2, %v3013_v33 }
 0x475   :  { %3259 = vmatprep.mubr.bf16.mxu1 %v3666_v2 }
 0x476   :  { %v3189_v23 = vpop.permute.xlu1 %3188 }
 0x477   :  { %v3200_v27 = vsel %vm1466_vm9, %v3187_v15, %v3189_v23  ;;  %v3201_v22 = vsel %vm1466_vm9, %v3189_v23, %v3191_v16 }
 0x478   :  { %v3210_v41 = vsel %vm86_vm1, %v3200_v27, 0  ;;  %3603 = vmatmul.mubr.msk.bf16.vlgmr.msra.gmra.mxu0 %vm82_vm2, %v3013_v33  ;;  %3604 = vmatprep.subr.msk.bf16.mxu1 %vm86_vm1, %v3201_v22 }
 0x479   :  { %3242 = vmatpush1.bf16.msra.mxu1 %v3210_v41  ;;  %3300 = vmatprep.mubr.bf16.mxu0 %v3666_v2 }
 0x47a   :  { %v3193_v29 = vpop.permute.xlu1 %3192 }
 0x47b   :  { %v3202_v34 = vsel %vm1466_vm9, %v3191_v16, %v3193_v29  ;;  %v3203_v53 = vsel %vm1466_vm9, %v3193_v29, %v3195_v55 }
 0x47c   :  { %v3216_v49 = vsel %vm86_vm1, %v3202_v34, 0  ;;  %3605 = vmatmul.mubr.msk.bf16.vlgmr.msra.gmra.mxu1 %vm82_vm2, %v3185_v9  ;;  %3606 = vmatprep.subr.msk.bf16.mxu0 %vm86_vm1, %v3203_v53 }
 0x47d   :  { %3283 = vmatpush1.bf16.msra.mxu0 %v3216_v49  ;;  %3341 = vmatprep.mubr.bf16.mxu1 %v3666_v2 }
 0x47e   :  { %v3199_v3 = vpop.permute.xlu1 %3198 }
 0x47f   :  { %v3205_v28 = vsel %vm1466_vm9, %v3197_v37, %v3199_v3 }
 0x480   :  { %3607 = vmatmul.mubr.msk.bf16.vlgmr.msra.gmra.mxu0 %vm82_vm2, %v3185_v9  ;;  %3608 = vmatprep.subr.msk.bf16.mxu1 %vm86_vm1, %v3205_v28 }
 0x481   :  { %3324 = vmatpush1.bf16.msra.mxu1 %v3222_v7 }
 0x484   :  { %3609 = vmatmul.mubr.msk.bf16.vlgmr.msra.gmra.mxu1 %vm82_vm2, %v3185_v9 }
 0x4d0   :  { %v1879_v63 = vpop.f32.mrf.mxu1 }
 0x4d2   :  { %v1881_v25 = vpop.f32.mrf.mxu1 }
 0x4d4   :  { %v1883_v48 = vpop.f32.mrf.mxu1 }
 0x4d6   :  { %v1884_v36 = vpop.f32.mrf.mxu1 }
 0x4d8   :  { %v1920_v45 = vpop.f32.mrf.mxu0 }
 0x4da   :  { %v1922_v51 = vpop.f32.mrf.mxu0 }
 0x4dc   :  { %v1924_v61 = vpop.f32.mrf.mxu0  ;;  %v1961_v2 = vpop.f32.mrf.mxu1 }
 0x4de   :  { %v1925_v52 = vpop.f32.mrf.mxu0  ;;  %v1963_v57 = vpop.f32.mrf.mxu1 }
 0x4e0   :  { %v1965_v10 = vpop.f32.mrf.mxu1  ;;  %v2043_v30 = vpop.f32.mrf.mxu0 }
 0x4e1   :  { %v2044_v12 = vadd.f32 %v2043_v30, %v1879_v63 }
 0x4e2   :  { %v1966_v47 = vpop.f32.mrf.mxu1  ;;  %v2045_v21 = vpop.f32.mrf.mxu0 }
 0x4e3   :  { %v2046_v33 = vadd.f32 %v2045_v21, %v1881_v25 }
 0x4e4   :  { %v2047_v54 = vpop.f32.mrf.mxu0  ;;  %v2084_v39 = vpop.f32.mrf.mxu1 }
 0x4e5   :  { %v2085_v46 = vadd.f32 %v2084_v39, %v1920_v45 }
 0x4e6   :  { %v2048_v56 = vpop.f32.mrf.mxu0  ;;  %v2086_v59 = vpop.f32.mrf.mxu1 }
 0x4e7   :  { %v2087_v60 = vadd.f32 %v2086_v59, %v1922_v51 }
 0x4e8   :  { %v2125_v24 = vpop.f32.mrf.mxu0  ;;  %v2088_v1 = vpop.f32.mrf.mxu1 }
 0x4e9   :  { %v2126_v40 = vadd.f32 %v2125_v24, %v1961_v2 }
 0x4ea   :  { %v2127_v11 = vpop.f32.mrf.mxu0  ;;  %v2089_v13 = vpop.f32.mrf.mxu1 }
 0x4eb   :  { %v2128_v19 = vadd.f32 %v2127_v11, %v1963_v57 }
 0x4ec   :  { %v2129_v26 = vpop.f32.mrf.mxu0 }
 0x4ee   :  { %v2130_v14 = vpop.f32.mrf.mxu0 }
 0x4f0   :  { %v2209_v15 = vpop.f32.mrf.mxu1 }
 0x4f1   :  { %v4487_v0 = vadd.f32 %v2209_v15, %v2044_v12 }
 0x4f2   :  { %v2211_v17 = vpop.f32.mrf.mxu1 }
 0x4f3   :  { %v4489_v18 = vadd.f32 %v2211_v17, %v2046_v33 }
 0x4f4   :  { %v2213_v32 = vpop.f32.mrf.mxu1  ;;  %v2250_v42 = vpop.f32.mrf.mxu0 }
 0x4f5   :  { %v4491_v44 = vadd.f32 %v2250_v42, %v2085_v46 }
 0x4f6   :  { %v2214_v16 = vpop.f32.mrf.mxu1  ;;  %v2252_v4 = vpop.f32.mrf.mxu0 }
 0x4f7   :  { %v4493_v8 = vadd.f32 %v2252_v4, %v2087_v60 }
 0x4f8   :  { %v2254_v43 = vpop.f32.mrf.mxu0  ;;  %v2291_v58 = vpop.f32.mrf.mxu1 }
 0x4f9   :  { %v4495_v35 = vadd.f32 %v2291_v58, %v2126_v40 }
 0x4fa   :  { %v2255_v9 = vpop.f32.mrf.mxu0  ;;  %v2293_v55 = vpop.f32.mrf.mxu1 }
 0x4fb   :  { %v4497_v23 = vadd.f32 %v2293_v55, %v2128_v19 }
 0x4fc   :  { %v2295_v27 = vpop.f32.mrf.mxu1 }
 0x4fe   :  { %v2296_v22 = vpop.f32.mrf.mxu1 }
 0x500   :  { %v2381_v41 = vpop.f32.mrf.mxu0 }
 0x501   :  { %v2470_v27 = vadd.f32 %v2381_v41, %v4487_v0 }
 0x502   :  { %v2383_v37 = vpop.f32.mrf.mxu0 }
 0x504   :  { %v2385_v29 = vpop.f32.mrf.mxu0  ;;  %v2422_v34 = vpop.f32.mrf.mxu1 }
 0x506   :  { %v2386_v53 = vpop.f32.mrf.mxu0  ;;  %v2424_v49 = vpop.f32.mrf.mxu1 }
 0x507   :  { %v2471_v53 = vadd.f32 %v2383_v37, %v4489_v18 }
 0x508   :  { %v2426_v50 = vpop.f32.mrf.mxu1  ;;  %v2463_v3 = vpop.f32.mrf.mxu0 }
 0x509   :  { %v2474_v0 = vadd.f32 %v2463_v3, %v4495_v35 }
 0x50a   :  { %v2427_v28 = vpop.f32.mrf.mxu1  ;;  %v4499_v7 = vpop.f32.mrf.mxu0 }
 0x50c   :  { %v2467_v63 = vpop.f32.mrf.mxu0  ;;  %v2551_v25 = vpop.f32.mrf.mxu1 }
 0x50d   :  { %v2640_v50 = vadd.f32 %v2551_v25, %v2470_v27 }
 0x50e   :  { %v2468_v48 = vpop.f32.mrf.mxu0  ;;  %v2553_v36 = vpop.f32.mrf.mxu1 }
 0x50f   :  { %v2472_v48 = vadd.f32 %v2422_v34, %v4491_v44  ;;  %v2475_v44 = vadd.f32 %v4499_v7, %v4497_v23 }
 0x510   :  { %v2555_v45 = vpop.f32.mrf.mxu1  ;;  %v2592_v51 = vpop.f32.mrf.mxu0 }
 0x511   :  { %v2641_v45 = vadd.f32 %v2553_v36, %v2471_v53 }
 0x512   :  { %v2556_v61 = vpop.f32.mrf.mxu1  ;;  %v2594_v2 = vpop.f32.mrf.mxu0 }
 0x514   :  { %v2596_v52 = vpop.f32.mrf.mxu0  ;;  %v2633_v57 = vpop.f32.mrf.mxu1 }
 0x515   :  { %v2644_v34 = vadd.f32 %v2633_v57, %v2474_v0 }
 0x516   :  { %v2597_v10 = vpop.f32.mrf.mxu0  ;;  %v2635_v30 = vpop.f32.mrf.mxu1 }
 0x518   :  { %v2637_v12 = vpop.f32.mrf.mxu1  ;;  %v2745_v47 = vpop.f32.mrf.mxu0 }
 0x519   :  { %v2834_v61 = vadd.f32 %v2745_v47, %v2640_v50  ;;  %v2473_v12 = vadd.f32 %v2424_v49, %v4493_v8 }
 0x51a   :  { %v2638_v21 = vpop.f32.mrf.mxu1  ;;  %v2747_v33 = vpop.f32.mrf.mxu0 }
 0x51b   :  { %v2642_v21 = vadd.f32 %v2592_v51, %v2472_v48  ;;  %v2645_v51 = vadd.f32 %v2635_v30, %v2475_v44 }
 0x51c   :  { %v2749_v54 = vpop.f32.mrf.mxu0  ;;  %v2786_v39 = vpop.f32.mrf.mxu1 }
 0x51d   :  { %v2835_v54 = vadd.f32 %v2747_v33, %v2641_v45  ;;  %v2836_v18 = vadd.f32 %v2786_v39, %v2642_v21 }
 0x51e   :  { %v2750_v46 = vpop.f32.mrf.mxu0  ;;  %v2788_v56 = vpop.f32.mrf.mxu1 }
 0x520   :  { %v2790_v59 = vpop.f32.mrf.mxu1  ;;  %v2827_v60 = vpop.f32.mrf.mxu0 }
 0x521   :  { %v2838_v33 = vadd.f32 %v2827_v60, %v2644_v34 }
 0x522   :  { %v2791_v24 = vpop.f32.mrf.mxu1  ;;  %v2829_v1 = vpop.f32.mrf.mxu0 }
 0x523   :  { %v2643_v24 = vadd.f32 %v2594_v2, %v2473_v12 }
 0x524   :  { %v2831_v40 = vpop.f32.mrf.mxu0  ;;  %v2917_v11 = vpop.f32.mrf.mxu1 }
 0x525   :  { %v3006_v46 = vadd.f32 %v2917_v11, %v2834_v61  ;;  %v2837_v40 = vadd.f32 %v2788_v56, %v2643_v24 }
 0x526   :  { %v2832_v13 = vpop.f32.mrf.mxu0  ;;  %v2919_v19 = vpop.f32.mrf.mxu1 }
 0x527   :  { %v3007_v37 = vadd.f32 %v2919_v19, %v2835_v54  ;;  %v2839_v19 = vadd.f32 %v2829_v1, %v2645_v51 }
 0x528   :  { %v2921_v26 = vpop.f32.mrf.mxu1  ;;  %v2958_v14 = vpop.f32.mrf.mxu0 }
 0x529   :  { %v3008_v13 = vadd.f32 %v2958_v14, %v2836_v18 }
 0x52a   :  { %v2922_v15 = vpop.f32.mrf.mxu1  ;;  %v2960_v17 = vpop.f32.mrf.mxu0 }
 0x52b   :  { %v3009_v11 = vadd.f32 %v2960_v17, %v2837_v40 }
 0x52c   :  { %v2962_v32 = vpop.f32.mrf.mxu0  ;;  %v2999_v42 = vpop.f32.mrf.mxu1 }
 0x52d   :  { %v3010_v26 = vadd.f32 %v2999_v42, %v2838_v33 }
 0x52e   :  { %v2963_v16 = vpop.f32.mrf.mxu0  ;;  %v3001_v4 = vpop.f32.mrf.mxu1 }
 0x52f   :  { %v3011_v30 = vadd.f32 %v3001_v4, %v2839_v19 }
 0x530   :  { %v3003_v43 = vpop.f32.mrf.mxu1  ;;  %v3089_v58 = vpop.f32.mrf.mxu0 }
 0x531   :  { %v3178_v25 = vadd.f32 %v3089_v58, %v3006_v46 }
 0x532   :  { %v3004_v9 = vpop.f32.mrf.mxu1  ;;  %v3091_v55 = vpop.f32.mrf.mxu0 }
 0x533   :  { %v3179_v8 = vadd.f32 %v3091_v55, %v3007_v37 }
 0x534   :  { %v3093_v22 = vpop.f32.mrf.mxu0  ;;  %v3130_v29 = vpop.f32.mrf.mxu1 }
 0x535   :  { %v3180_v2 = vadd.f32 %v3130_v29, %v3008_v13 }
 0x536   :  { %v3094_v28 = vpop.f32.mrf.mxu0  ;;  %v3132_v63 = vpop.f32.mrf.mxu1 }
 0x537   :  { %v3181_v7 = vadd.f32 %v3132_v63, %v3009_v11 }
 0x538   :  { %v3134_v52 = vpop.f32.mrf.mxu1  ;;  %v3171_v10 = vpop.f32.mrf.mxu0 }
 0x539   :  { %v3182_v17 = vadd.f32 %v3171_v10, %v3010_v26 }
 0x53a   :  { %v3135_v41 = vpop.f32.mrf.mxu1  ;;  %v3173_v59 = vpop.f32.mrf.mxu0 }
 0x53b   :  { %v3183_v9 = vadd.f32 %v3173_v59, %v3011_v30 }
 0x53c   :  { %v3175_v36 = vpop.f32.mrf.mxu0  ;;  %v3261_v47 = vpop.f32.mrf.mxu1 }
 0x53d   :  { %v4508_v49 = vadd.f32 %v3261_v47, %v3178_v25 }
 0x53e   :  { %v3176_v35 = vpop.f32.mrf.mxu0  ;;  %v3263_v3 = vpop.f32.mrf.mxu1 }
 0x53f   :  { %v4510_v39 = vadd.f32 %v3263_v3, %v3179_v8  ;;  %v3356_v57 = vmul.f32 %v4508_v49, %v4083_v6 }
 0x540   :  { %v3265_v15 = vpop.f32.mrf.mxu1  ;;  %v3302_v23 = vpop.f32.mrf.mxu0 }
 0x541   :  { %v3357_v56 = vmul.f32 %v4510_v39, %v4089_v20  ;;  %v4516_v14 = vadd.f32 %v3302_v23, %v3180_v2  ;;  %v1775_v23 = vld [vmem:[%s4571_s6] sm:$0xff] }
 0x542   :  { %v3266_v60 = vpop.f32.mrf.mxu1  ;;  %v3304_v32 = vpop.f32.mrf.mxu0 }
 0x543   :  { %v3362_v16 = vadd.f32 %v3357_v56, %v3356_v57  ;;  %v3358_v1 = vmul.f32 %v4516_v14, %v4098_v38  ;;  %v3353_v42 = vadd.f32 %v3304_v32, %v3181_v7  ;;  %v1776_v56 = vld [vmem:[%s4572_s7] sm:$0xff] }
 0x544   :  { %v3306_v43 = vpop.f32.mrf.mxu0  ;;  %v3343_v58 = vpop.f32.mrf.mxu1 }
 0x545   :  { %v3363_v55 = vadd.f32 %v3362_v16, %v3358_v1  ;;  %v3359_v27 = vmul.f32 %v3353_v42, %v4101_v5  ;;  %v3354_v22 = vadd.f32 %v3343_v58, %v3182_v17 }
 0x546   :  { %v3307_v29 = vpop.f32.mrf.mxu0  ;;  %v3345_v53 = vpop.f32.mrf.mxu1 }
 0x547   :  { %v3364_v50 = vadd.f32 %v3363_v55, %v3359_v27  ;;  %v3360_v4 = vmul.f32 %v3354_v22, %v4111_v62  ;;  %v3355_v28 = vadd.f32 %v3345_v53, %v3183_v9 }
 0x548   :  { %v3347_v63 = vpop.f32.mrf.mxu1 }
 0x549   :  { %v3361_v48 = vmul.f32 %v3355_v28, %v4117_v31  ;;  %v3365_v45 = vadd.f32 %v3364_v50, %v3360_v4 }
 0x54a   :  { %v3348_v61 = vpop.f32.mrf.mxu1 }
 0x54b   :  { %v3366_v52 = vadd.f32 %v3365_v45, %v3361_v48 }
 0x54d   :  { %3367 = vadd.xlane.f32.xlu0 %v3366_v52 }
 0x5d6   :  { %v3368_v10 = vpop.xlane.xlu0 %3367 }
 0x5d7   :  { %v3369_v12 = vmul.f32 0.001953125, %v3368_v10 }
 0x5d9   :  { %v3370_v21 = vsub.f32 %v4508_v49, %v3369_v12  ;;  %v3371_v54 = vsub.f32 %v4510_v39, %v3369_v12  ;;  %v3372_v46 = vsub.f32 %v4516_v14, %v3369_v12  ;;  %v3373_v0 = vsub.f32 %v3353_v42, %v3369_v12 }
 0x5da   :  { %v3374_v41 = vsub.f32 %v3354_v22, %v3369_v12  ;;  %v3375_v37 = vsub.f32 %v3355_v28, %v3369_v12 }
 0x5db   :  { %v3376_v59 = vmul.f32 %v3370_v21, %v4083_v6  ;;  %v3377_v24 = vmul.f32 %v3371_v54, %v4089_v20  ;;  %v3378_v18 = vmul.f32 %v3372_v46, %v4098_v38  ;;  %v3379_v25 = vmul.f32 %v3373_v0, %v4101_v5 }
 0x5dc   :  { %v3380_v36 = vmul.f32 %v3374_v41, %v4111_v62  ;;  %v3381_v13 = vmul.f32 %v3375_v37, %v4117_v31 }
 0x5dd   :  { %v3382_v44 = vmul.f32 %v3376_v59, %v3376_v59  ;;  %v3383_v34 = vmul.f32 %v3377_v24, %v3377_v24  ;;  %v3384_v47 = vmul.f32 %v3378_v18, %v3378_v18  ;;  %v3385_v8 = vmul.f32 %v3379_v25, %v3379_v25 }
 0x5de   :  { %v3386_v33 = vmul.f32 %v3380_v36, %v3380_v36  ;;  %v3387_v3 = vmul.f32 %v3381_v13, %v3381_v13 }
 0x5df   :  { %v3388_v40 = vadd.f32 %v3383_v34, %v3382_v44 }
 0x5e1   :  { %v3389_v51 = vadd.f32 %v3388_v40, %v3384_v47 }
 0x5e3   :  { %v3390_v35 = vadd.f32 %v3389_v51, %v3385_v8 }
 0x5e5   :  { %v3391_v11 = vadd.f32 %v3390_v35, %v3386_v33 }
 0x5e7   :  { %v3392_v2 = vadd.f32 %v3391_v11, %v3387_v3 }
 0x5e9   :  { %3393 = vadd.xlane.f32.xlu1 %v3392_v2 }
 0x672   :  { %v3394_v19 = vpop.xlane.xlu1 %3393 }
 0x673   :  { %v3395_v26 = vmul.f32 0.001953125, %v3394_v19 }
 0x675   :  { %v3396_v15 = vadd.f32 1e-05, %v3395_v26 }
 0x677   :  { %3658 = vrsqrt.f32 %v3396_v15 }
 0x684   :  { %v3659_v7 = vpop.eup %3658 }
 0x685   :  { %v3398_v57 = vmul.f32 %v3659_v7, %v1775_v23 }
 0x687   :  { %3403 = vperm.xlu0 %3630, %v3398_v57   ;;  %v3399_v30 = vmul.f32 %v3398_v57, %v3369_v12 }
 0x689   :  { %v3400_v60 = vsub.f32 %v1776_v56, %v3399_v30 }
 0x68b   :  { %3414 = vperm.xlu1 %3631, %v3400_v60  }
 0x702   :  { %v3404_v32 = vpop.permute.xlu0 %3403 }
 0x703   :  { %v3406_v17 = vmul.f32 %v3404_v32, %v4508_v49  ;;  %v3407_v16 = vmul.f32 %v3404_v32, %v4510_v39  ;;  %v3408_v1 = vmul.f32 %v3404_v32, %v4516_v14  ;;  %v3409_v43 = vmul.f32 %v3404_v32, %v3353_v42 }
 0x704   :  { %v3410_v58 = vmul.f32 %v3404_v32, %v3354_v22  ;;  %v3411_v9 = vmul.f32 %v3404_v32, %v3355_v28 }
 0x706   :  { %v3415_v55 = vpop.permute.xlu1 %3414 }
 0x707   :  { %v3417_v27 = vadd.f32 %v3415_v55, %v3406_v17  ;;  %v3418_v29 = vadd.f32 %v3415_v55, %v3407_v16  ;;  %v3419_v53 = vadd.f32 %v3415_v55, %v3408_v1  ;;  %v3420_v50 = vadd.f32 %v3415_v55, %v3409_v43 }
 0x708   :  { %v3421_v4 = vadd.f32 %v3415_v55, %v3410_v58  ;;  %v3422_v63 = vadd.f32 %v3415_v55, %v3411_v9 }
 0x709   :  { %vm3423_vm0 = vcmp.gt.f32.partialorder %v3417_v27, 0.0  ;;  %vm3424_vm1 = vcmp.gt.f32.partialorder %v3418_v29, 0.0  ;;  %vm3425_vm2 = vcmp.gt.f32.partialorder %v3419_v53, 0.0  ;;  %vm3426_vm3 = vcmp.gt.f32.partialorder %v3420_v50, 0.0 }
 0x70a   :  { %vm3427_vm4 = vcmp.gt.f32.partialorder %v3421_v4, 0.0  ;;  %vm3428_vm5 = vcmp.gt.f32.partialorder %v3422_v63, 0.0  ;;  %v3429_v49 = vmul.f32 0.01, %v3417_v27  ;;  %v3430_v39 = vmul.f32 0.01, %v3418_v29 }
 0x70b   :  { %v3431_v48 = vmul.f32 0.01, %v3419_v53  ;;  %v3432_v14 = vmul.f32 0.01, %v3420_v50  ;;  %v3433_v42 = vmul.f32 0.01, %v3421_v4 }
 0x70c   :  { %v3434_v22 = vmul.f32 0.01, %v3422_v63  ;;  %v3435_v28 = vsel %vm3423_vm0, %v3417_v27, %v3429_v49  ;;  %v3436_v45 = vsel %vm3424_vm1, %v3418_v29, %v3430_v39 }
 0x70d   :  { %v3437_v61 = vsel %vm3425_vm2, %v3419_v53, %v3431_v48  ;;  %v3438_v52 = vsel %vm3426_vm3, %v3420_v50, %v3432_v14  ;;  %v3439_v10 = vsel %vm3427_vm4, %v3421_v4, %v3433_v42  ;;  %v3441_v12 = vmul.f32 %v3435_v28, %v4083_v6 }
 0x70e   :  { %v3440_v21 = vsel %vm3428_vm5, %v3422_v63, %v3434_v22  ;;  %v3442_v54 = vmul.f32 %v3436_v45, %v4089_v20  ;;  %v3443_v46 = vmul.f32 %v3437_v61, %v4098_v38  ;;  %v3444_v0 = vmul.f32 %v3438_v52, %v4101_v5 }
 0x70f   :  { %v3445_v41 = vmul.f32 %v3439_v10, %v4111_v62  ;;  %v3446_v59 = vmul.f32 %v3440_v21, %v4117_v31  ;;  %3447 = vst [vmem:[%s4573_s8] sm:$0xff] %v3441_v12 }
 0x710   :  { %3448 = vst [vmem:[%s4573_s8 + $0x8] sm:$0xff] %v3442_v54  ;;  %3449 = vst [vmem:[%s4573_s8 + $0x10] sm:$0xff] %v3443_v46 }
 0x711   :  { %3450 = vst [vmem:[%s4573_s8 + $0x18] sm:$0xff] %v3444_v0  ;;  %3451 = vst [vmem:[%s4573_s8 + $0x20] sm:$0xff] %v3445_v41 }
 0x712   :  { %3452 = vst [vmem:[%s4573_s8 + $0x28] sm:$0xff] %v3446_v59 }

</bundles_post_ra>
